<compile_context>
chip_gen: v6e
topology: v6e:2x2x1
jax: 0.10.0
libtpu: 0.0.40
codegen_flags: <defaults>
</compile_context>

<pallas_src>
import functools

import jax
import jax.numpy as jnp
from jax.experimental import pallas as pl
from jax.experimental.pallas import tpu as pltpu


# -----------------------------------------------------------------------------
# Helpers
# -----------------------------------------------------------------------------
def _round_up(x, m):
    return (x + m - 1) // m * m


def _pad_gate_cols(w, h, hp):
    """[..., 3h] -> [..., 3hp]: each GRU gate block zero-padded to width hp."""
    parts = []
    for g in range(3):
        blk = w[..., g * h:(g + 1) * h]
        parts.append(jnp.pad(blk, [(0, 0)] * (w.ndim - 1) + [(0, hp - h)]))
    return jnp.concatenate(parts, axis=-1)


# -----------------------------------------------------------------------------
# Pallas kernels
# -----------------------------------------------------------------------------
def linear_kernel(x_ref, w_ref, b_ref, o_ref, *, activation):
    """o = act(x @ w + b); w block is bf16, accumulate in f32."""
    y = jnp.dot(x_ref[...].astype(jnp.bfloat16), w_ref[...],
                preferred_element_type=jnp.float32)
    y = y + b_ref[...]
    if activation == "tanh":
        y = jnp.tanh(y)
    o_ref[...] = y


def bigru_encoder_kernel(len_ref, gi_fwd_ref, gi_bwd_ref, whh_ref, bhh_ref,
                         h_ref):
    """Fused fwd+bwd GRU step.

    h_ref is resident (constant index_map) and carries [h_fwd | h_bwd] across
    the serial time grid. gi_* blocks are the precomputed input projections
    (bwd already time-reversed via its index_map). One block-diagonal MXU dot
    covers both directions.
    """
    t = pl.program_id(0)
    T = pl.num_programs(0)
    hp = h_ref.shape[-1] // 2

    @pl.when(t == 0)
    def _():
        h_ref[...] = jnp.zeros_like(h_ref)

    h = h_ref[...]                                        # [Bp, 2*Hp] f32
    gh = jnp.dot(h.astype(jnp.bfloat16), whh_ref[...],
                 preferred_element_type=jnp.float32) + bhh_ref[...]  # [Bp, 6*Hp]
    lens = len_ref[...]                                   # [Bp, 1] int32

    new_h = []
    for d in range(2):                                    # 0 = fwd, 1 = bwd
        gi_d = (gi_fwd_ref if d == 0 else gi_bwd_ref)[0]  # [Bp, 3*Hp]
        gh_d = gh[:, d * 3 * hp:(d + 1) * 3 * hp]
        h_d = h[:, d * hp:(d + 1) * hp]
        r = jax.nn.sigmoid(gi_d[:, :hp] + gh_d[:, :hp])
        z = jax.nn.sigmoid(gi_d[:, hp:2 * hp] + gh_d[:, hp:2 * hp])
        n = jnp.tanh(gi_d[:, 2 * hp:] + r * gh_d[:, 2 * hp:])
        cand = (1.0 - z) * n + z * h_d
        time_idx = t if d == 0 else T - 1 - t
        m = (time_idx < lens).astype(jnp.float32)         # [Bp, 1]
        new_h.append(m * cand + (1.0 - m) * h_d)
    h_ref[...] = jnp.concatenate(new_h, axis=-1)


def gru_decoder_kernel(gi_ref, whh_ref, bhh_ref, h0_ref, hs_ref, h_scr):
    """Single-direction GRU step (teacher forcing); emits every hidden state."""
    t = pl.program_id(0)
    hp = h0_ref.shape[-1]

    @pl.when(t == 0)
    def _():
        h_scr[...] = h0_ref[...]

    h = h_scr[...]                                        # [Bp, Hp]
    gh = jnp.dot(h.astype(jnp.bfloat16), whh_ref[...],
                 preferred_element_type=jnp.float32) + bhh_ref[...]
    gi = gi_ref[0]
    r = jax.nn.sigmoid(gi[:, :hp] + gh[:, :hp])
    z = jax.nn.sigmoid(gi[:, hp:2 * hp] + gh[:, hp:2 * hp])
    n = jnp.tanh(gi[:, 2 * hp:] + r * gh[:, 2 * hp:])
    h_new = (1.0 - z) * n + z * h
    h_scr[...] = h_new
    hs_ref[0] = h_new


# -----------------------------------------------------------------------------
# Pallas-call wrappers
# -----------------------------------------------------------------------------
def linear_run(x, w, b, activation=None, tile_m=512, tile_n=1024):
    """y = act(x @ w + b); tiled over (rows, cols), bf16 weight streaming."""
    M, K = x.shape
    N = w.shape[1]
    tm = min(tile_m, _round_up(M, 8))
    tn = min(tile_n, _round_up(N, 128))
    Mp = _round_up(M, tm)
    Np = _round_up(N, tn)
    if Mp != M:
        x = jnp.pad(x, ((0, Mp - M), (0, 0)))
    if Np != N:
        w = jnp.pad(w, ((0, 0), (0, Np - N)))
        b = jnp.pad(b, ((0, 0), (0, Np - N)))
    w = w.astype(jnp.bfloat16)
    b = b.astype(jnp.float32)

    out = pl.pallas_call(
        functools.partial(linear_kernel, activation=activation),
        out_shape=jax.ShapeDtypeStruct((Mp, Np), jnp.float32),
        grid_spec=pltpu.PrefetchScalarGridSpec(
            num_scalar_prefetch=0,
            grid=(Mp // tm, Np // tn),
            in_specs=[
                pl.BlockSpec((tm, K), lambda i, j: (i, 0)),
                pl.BlockSpec((K, tn), lambda i, j: (0, j)),
                pl.BlockSpec((1, tn), lambda i, j: (0, j)),
            ],
            out_specs=pl.BlockSpec((tm, tn), lambda i, j: (i, j)),
        ),
        compiler_params=pltpu.CompilerParams(
            dimension_semantics=("parallel", "parallel")),
    )(x, w, b)
    if Mp != M or Np != N:
        out = out[:M, :N]
    return out


def bigru_encoder_run(lens, gi, whh, bhh, Hp):
    """lens:[Sp,1] i32, gi:[T,Sp,6Hp] f32 (cols [0:3Hp]=fwd, [3Hp:6Hp]=bwd),
    whh:[2Hp,6Hp] bf16 block-diag, bhh:[1,6Hp] f32 -> h:[Sp,2Hp] f32."""
    T, Sp, _ = gi.shape
    grid_spec = pltpu.PrefetchScalarGridSpec(
        num_scalar_prefetch=0,
        grid=(T,),
        in_specs=[
            pl.BlockSpec((Sp, 1), lambda t: (0, 0)),                    # lengths (resident)
            pl.BlockSpec((1, Sp, 3 * Hp), lambda t: (t, 0, 0)),         # gi fwd
            pl.BlockSpec((1, Sp, 3 * Hp), lambda t: (T - 1 - t, 0, 1)), # gi bwd (reversed in index_map)
            pl.BlockSpec((2 * Hp, 6 * Hp), lambda t: (0, 0)),           # block-diag Whh (bf16)
            pl.BlockSpec((1, 6 * Hp), lambda t: (0, 0)),                # bhh
        ],
        out_specs=pl.BlockSpec((Sp, 2 * Hp), lambda t: (0, 0)),         # carried hidden
    )
    return pl.pallas_call(
        bigru_encoder_kernel,
        out_shape=jax.ShapeDtypeStruct((Sp, 2 * Hp), jnp.float32),
        grid_spec=grid_spec,
        compiler_params=pltpu.CompilerParams(dimension_semantics=("arbitrary",)),
    )(lens, gi, gi, whh, bhh)


def gru_decoder_run(gi, whh, bhh, h0):
    """gi:[T,Bp,3Hp] f32, whh:[Hp,3Hp] bf16, bhh:[1,3Hp] f32, h0:[Bp,Hp] f32
    -> hs:[T,Bp,Hp] f32."""
    T, Bp, _ = gi.shape
    Hp = h0.shape[-1]
    grid_spec = pltpu.PrefetchScalarGridSpec(
        num_scalar_prefetch=0,
        grid=(T,),
        in_specs=[
            pl.BlockSpec((1, Bp, 3 * Hp), lambda t: (t, 0, 0)),
            pl.BlockSpec((Hp, 3 * Hp), lambda t: (0, 0)),
            pl.BlockSpec((1, 3 * Hp), lambda t: (0, 0)),
            pl.BlockSpec((Bp, Hp), lambda t: (0, 0)),
        ],
        out_specs=pl.BlockSpec((1, Bp, Hp), lambda t: (t, 0, 0)),
        scratch_shapes=[pltpu.VMEM((Bp, Hp), jnp.float32)],
    )
    return pl.pallas_call(
        gru_decoder_kernel,
        out_shape=jax.ShapeDtypeStruct((T, Bp, Hp), jnp.float32),
        grid_spec=grid_spec,
        compiler_params=pltpu.CompilerParams(dimension_semantics=("arbitrary",)),
    )(gi, whh, bhh, h0)


# -----------------------------------------------------------------------------
# Parameter packing into lane-dense padded layouts (gate blocks at k*Hp)
# -----------------------------------------------------------------------------
def _pack_encoder_params(p, H, Hp):
    wih = jnp.concatenate([_pad_gate_cols(p["enc_fwd_wih"], H, Hp),
                           _pad_gate_cols(p["enc_bwd_wih"], H, Hp)], axis=-1)
    bih = jnp.concatenate([_pad_gate_cols(p["enc_fwd_bih"], H, Hp),
                           _pad_gate_cols(p["enc_bwd_bih"], H, Hp)], axis=-1)
    whh_f = _pad_gate_cols(jnp.pad(p["enc_fwd_whh"], ((0, Hp - H), (0, 0))), H, Hp)
    whh_b = _pad_gate_cols(jnp.pad(p["enc_bwd_whh"], ((0, Hp - H), (0, 0))), H, Hp)
    whh = jnp.zeros((2 * Hp, 6 * Hp), jnp.float32)
    whh = whh.at[:Hp, :3 * Hp].set(whh_f).at[Hp:, 3 * Hp:].set(whh_b)
    bhh = jnp.concatenate([_pad_gate_cols(p["enc_fwd_bhh"], H, Hp),
                           _pad_gate_cols(p["enc_bwd_bhh"], H, Hp)], axis=-1)
    return wih, bih, whh.astype(jnp.bfloat16), bhh


def _pack_decoder_params(p, Hd, Hdp):
    wih = _pad_gate_cols(p["dec_wih"], Hd, Hdp)
    bih = _pad_gate_cols(p["dec_bih"], Hd, Hdp)
    whh = _pad_gate_cols(jnp.pad(p["dec_whh"], ((0, Hdp - Hd), (0, 0))), Hd, Hdp)
    bhh = _pad_gate_cols(p["dec_bhh"], Hd, Hdp)
    return wih, bih, whh.astype(jnp.bfloat16), bhh


def _pack_mapper_params(p, H, Hp, Hd, Hdp):
    # context layout after padding: [h_fwd(H), 0.., h_bwd(H), 0..] of width 2*Hp
    w, b = p["map_w"], p["map_b"]                    # [2H, Hd], [1, Hd]
    wp = jnp.zeros((2 * Hp, Hdp), jnp.float32)
    wp = wp.at[:H, :Hd].set(w[:H]).at[Hp:Hp + H, :Hd].set(w[H:2 * H])
    bp = jnp.pad(b, ((0, 0), (0, Hdp - Hd)))
    return wp, bp


# -----------------------------------------------------------------------------
# AEMapper forward (training path, decode=False)
# -----------------------------------------------------------------------------
def _ae_mapper_forward(params, input_sentences, input_sentence_length,
                       input_conversation_length, target_sentences):
    S, T = input_sentences.shape
    C, Td = target_sentences.shape
    E = params["emb_enc"].shape[1]
    H = params["enc_fwd_whh"].shape[0]
    Hd = params["dec_whh"].shape[0]
    V = params["out_w"].shape[1]

    Hp = _round_up(H, 128)       # lane-dense hidden
    Hdp = _round_up(Hd, 128)
    Sp = _round_up(S, 8)         # sublane-dense batch
    Cp = _round_up(C, 8)

    enc_wih, enc_bih, enc_whh, enc_bhh = _pack_encoder_params(params, H, Hp)
    dec_wih, dec_bih, dec_whh, dec_bhh = _pack_decoder_params(params, Hd, Hdp)
    map_w, map_b = _pack_mapper_params(params, H, Hp, Hd, Hdp)
    out_w = jnp.pad(params["out_w"], ((0, Hdp - Hd), (0, 0)))          # [Hdp, V]
    out_b = params["out_b"]

    # ---- source encoder: fused bidirectional GRU ----------------------------
    x_emb = jnp.take(params["emb_enc"], input_sentences, axis=0)       # [S, T, E]
    x_t = jnp.transpose(x_emb, (1, 0, 2))                              # time-major
    x_t = jnp.pad(x_t, ((0, 0), (0, Sp - S), (0, 0)))                  # [T, Sp, E]
    # hoisted input projection for both directions: one big matmul
    gi_enc = linear_run(x_t.reshape(T * Sp, E), enc_wih, enc_bih)
    gi_enc = gi_enc.reshape(T, Sp, 6 * Hp)
    lens = jnp.pad(input_sentence_length.astype(jnp.int32), (0, Sp - S))[:, None]
    h_enc = bigru_encoder_run(lens, gi_enc, enc_whh, enc_bhh, Hp)      # [Sp, 2Hp]

    # ---- conversation cumsum / take-last (traced, no host sync) -------------
    conv_len = input_conversation_length.astype(jnp.int32)
    start = jnp.concatenate([jnp.zeros((1,), jnp.int32), jnp.cumsum(conv_len[:-1])])
    max_len = jnp.max(conv_len)
    last_idx = jnp.clip(start + max_len - 1, 0, S - 1)
    # mirrors torch pad(...)[:, -1, :]: zeros unless conversation length == max_len
    ctx = jnp.where((conv_len == max_len)[:, None],
                    jnp.take(h_enc, last_idx, axis=0), 0.0)            # [C, 2Hp]
    ctx = jnp.pad(ctx, ((0, Cp - C), (0, 0)))

    # ---- mapper: FeedForward(context_size, num_layers*dec_H), tanh ----------
    init_h = linear_run(ctx, map_w, map_b, activation="tanh")          # [Cp, Hdp]

    # ---- source decoder (teacher forcing) + vocab projection ----------------
    tgt_emb = jnp.take(params["emb_dec"], target_sentences, axis=0)    # [C, Td, E]
    tgt_t = jnp.pad(jnp.transpose(tgt_emb, (1, 0, 2)), ((0, 0), (0, Cp - C), (0, 0)))
    gi_dec = linear_run(tgt_t.reshape(Td * Cp, E), dec_wih, dec_bih)
    gi_dec = gi_dec.reshape(Td, Cp, 3 * Hdp)
    hs_dec = gru_decoder_run(gi_dec, dec_whh, dec_bhh, init_h)         # [Td, Cp, Hdp]

    logits = linear_run(hs_dec.reshape(Td * Cp, Hdp), out_w, out_b)    # [Td*Cp, V]
    logits = logits.reshape(Td, Cp, V)[:, :C, :]
    return jnp.transpose(logits, (1, 0, 2))                            # [C, Td, V]


ae_mapper_forward = jax.jit(_ae_mapper_forward)


# -----------------------------------------------------------------------------
# Deterministic parameter init + example run
# -----------------------------------------------------------------------------
def init_params(key, vocab, emb, enc_H, dec_H, context_size, num_layers):
    ks = iter(jax.random.split(key, 24))
    n = lambda shape: (0.1 * jax.random.normal(next(ks), shape)).astype(jnp.float32)
    p = {
        "emb_enc": n((vocab, emb)),
        "emb_dec": n((vocab, emb)),
        "map_w": n((context_size, num_layers * dec_H)),
        "map_b": n((1, num_layers * dec_H)),
        "dec_wih": n((emb, 3 * dec_H)),
        "dec_whh": n((dec_H, 3 * dec_H)),
        "dec_bih": n((1, 3 * dec_H)),
        "dec_bhh": n((1, 3 * dec_H)),
        "out_w": n((dec_H, vocab)),
        "out_b": n((1, vocab)),
    }
    for d in ("fwd", "bwd"):
        p[f"enc_{d}_wih"] = n((emb, 3 * enc_H))
        p[f"enc_{d}_whh"] = n((enc_H, 3 * enc_H))
        p[f"enc_{d}_bih"] = n((1, 3 * enc_H))
        p[f"enc_{d}_bhh"] = n((1, 3 * enc_H))
    return p


if __name__ == "__main__":
    vocab_size = 32
    embed_size = 16
    encoder_hidden_size = 16
    decoder_hidden_size = 16
    num_layers = 1
    context_size = 2 * num_layers * encoder_hidden_size  # bi-GRU flattened hidden
    seq_len = 8

    key = jax.random.PRNGKey(0)
    k_p, k_in, k_len, k_tgt = jax.random.split(key, 4)

    params = init_params(k_p, vocab_size, embed_size, encoder_hidden_size,
                         decoder_hidden_size, context_size, num_layers)

    num_sentences = 5
    input_sentences = jax.random.randint(k_in, (num_sentences, seq_len), 0, vocab_size)
    input_sentence_length = jnp.array([8, 5, 3, 8, 6], jnp.int32)
    input_conversation_length = jnp.array([3, 2], jnp.int32)      # 2 conversations
    num_conversations = input_conversation_length.shape[0]
    target_sentences = jax.random.randint(k_tgt, (num_conversations, seq_len), 0, vocab_size)

    out = ae_mapper_forward(params, input_sentences, input_sentence_length,
                            input_conversation_length, target_sentences)
    out = jax.block_until_ready(out)
    assert out.shape == (num_conversations, seq_len, vocab_size)
    assert out.dtype == jnp.float32
    assert bool(jnp.all(jnp.isfinite(out)))
    print("KERNEL_OK")
</pallas_src>

<mosaic_0001>
module attributes {stable_mosaic.version = 11 : i64} {
  func.func @linear_kernel(%arg0: i32, %arg1: i32, %arg2: memref<64x16xf32, #tpu.memory_space<vmem>>, %arg3: memref<16x768xbf16, #tpu.memory_space<vmem>>, %arg4: memref<1x768xf32, #tpu.memory_space<vmem>>, %arg5: memref<64x768xf32, #tpu.memory_space<vmem>>) attributes {dimension_semantics = [#tpu.dimension_semantics<parallel>, #tpu.dimension_semantics<parallel>], iteration_bounds = array<i64: 1, 1>, scalar_prefetch = 0 : i64, scratch_operands = 0 : i64, tpu.core_type = #tpu.core_type<tc>, window_params = [{transform_indices = @transform_0, window_bounds = array<i64: 64, 16>}, {transform_indices = @transform_1, window_bounds = array<i64: 16, 768>}, {transform_indices = @transform_2, window_bounds = array<i64: 1, 768>}, {transform_indices = @transform_3, window_bounds = array<i64: 64, 768>}]} {
    %c0 = arith.constant 0 : index
    %c0_0 = arith.constant 0 : index
    %0 = vector.load %arg2[%c0, %c0_0] : memref<64x16xf32, #tpu.memory_space<vmem>>, vector<64x16xf32>
    %1 = arith.truncf %0 : vector<64x16xf32> to vector<64x16xbf16>
    %c0_1 = arith.constant 0 : index
    %c0_2 = arith.constant 0 : index
    %2 = vector.load %arg3[%c0_1, %c0_2] : memref<16x768xbf16, #tpu.memory_space<vmem>>, vector<16x768xbf16>
    %cst = arith.constant dense<0.000000e+00> : vector<64x768xf32>
    %3 = tpu.matmul %1, %2, %cst {dimension_numbers = #tpu.dot_dimension_numbers<[1], [0], [0], [1], [0, 0, 1, 1], [], []>} : vector<64x16xbf16>, vector<16x768xbf16>, vector<64x768xf32> -> vector<64x768xf32>
    %c0_3 = arith.constant 0 : index
    %c0_4 = arith.constant 0 : index
    %4 = vector.load %arg4[%c0_3, %c0_4] : memref<1x768xf32, #tpu.memory_space<vmem>>, vector<1x768xf32>
    %5 = vector.broadcast %4 : vector<1x768xf32> to vector<64x768xf32>
    %6 = arith.addf %3, %5 : vector<64x768xf32>
    %c0_5 = arith.constant 0 : index
    %c0_6 = arith.constant 0 : index
    %7 = vector.load %arg5[%c0_5, %c0_6] : memref<64x768xf32, #tpu.memory_space<vmem>>, vector<64x768xf32>
    tpu.vector_store %arg5[%c0_5, %c0_6], %6 {strides = array<i32>} : memref<64x768xf32, #tpu.memory_space<vmem>>, vector<64x768xf32>,
    return
  }
  func.func @transform_0(%arg0: i32, %arg1: i32) -> (i32, i32) {
    %c0_i32 = arith.constant 0 : i32
    %c0_i32_0 = arith.constant 0 : i32
    return %arg0, %c0_i32 : i32, i32
  }
  func.func @transform_1(%arg0: i32, %arg1: i32) -> (i32, i32) {
    %c0_i32 = arith.constant 0 : i32
    %c0_i32_0 = arith.constant 0 : i32
    return %c0_i32, %arg1 : i32, i32
  }
  func.func @transform_2(%arg0: i32, %arg1: i32) -> (i32, i32) {
    %c0_i32 = arith.constant 0 : i32
    %c0_i32_0 = arith.constant 0 : i32
    return %c0_i32, %arg1 : i32, i32
  }
  func.func @transform_3(%arg0: i32, %arg1: i32) -> (i32, i32) {
    %c0_i32 = arith.constant 0 : i32
    return %arg0, %arg1 : i32, i32
  }
}

module attributes {stable_mosaic.version = 11 : i64} {
  func.func @bigru_encoder_kernel(%arg0: i32, %arg1: memref<8x1xi32, #tpu.memory_space<vmem>>, %arg2: memref<1x8x384xf32, #tpu.memory_space<vmem>>, %arg3: memref<1x8x384xf32, #tpu.memory_space<vmem>>, %arg4: memref<256x768xbf16, #tpu.memory_space<vmem>>, %arg5: memref<1x768xf32, #tpu.memory_space<vmem>>, %arg6: memref<8x256xf32, #tpu.memory_space<vmem>>) attributes {dimension_semantics = [#tpu.dimension_semantics<arbitrary>], iteration_bounds = array<i64: 8>, scalar_prefetch = 0 : i64, scratch_operands = 0 : i64, tpu.core_type = #tpu.core_type<tc>, window_params = [{pipeline_mode = #tpu.pipeline_mode<synchronous>, transform_indices = @transform_0, window_bounds = array<i64: 8, 1>}, {transform_indices = @transform_1, window_bounds = array<i64: 1, 8, 384>}, {transform_indices = @transform_2, window_bounds = array<i64: 1, 8, 384>}, {pipeline_mode = #tpu.pipeline_mode<synchronous>, transform_indices = @transform_3, window_bounds = array<i64: 256, 768>}, {pipeline_mode = #tpu.pipeline_mode<synchronous>, transform_indices = @transform_4, window_bounds = array<i64: 1, 768>}, {pipeline_mode = #tpu.pipeline_mode<synchronous>, transform_indices = @transform_5, window_bounds = array<i64: 8, 256>}]} {
    %c0_i32 = arith.constant 0 : i32
    %0 = arith.cmpi eq, %arg0, %c0_i32 : i32
    %1 = arith.extui %0 : i1 to i32
    %c0_i32_0 = arith.constant 0 : i32
    %2 = arith.cmpi ne, %1, %c0_i32_0 : i32
    scf.if %2 {
      %cst_24 = arith.constant 0.000000e+00 : f32
      %96 = vector.broadcast %cst_24 : f32 to vector<8x256xf32>
      %c0_25 = arith.constant 0 : index
      %c0_26 = arith.constant 0 : index
      %97 = vector.load %arg6[%c0_25, %c0_26] : memref<8x256xf32, #tpu.memory_space<vmem>>, vector<8x256xf32>
      tpu.vector_store %arg6[%c0_25, %c0_26], %96 {strides = array<i32>} : memref<8x256xf32, #tpu.memory_space<vmem>>, vector<8x256xf32>,
    } else {
    }
    %c0 = arith.constant 0 : index
    %c0_1 = arith.constant 0 : index
    %3 = vector.load %arg6[%c0, %c0_1] : memref<8x256xf32, #tpu.memory_space<vmem>>, vector<8x256xf32>
    %4 = arith.truncf %3 : vector<8x256xf32> to vector<8x256xbf16>
    %c0_2 = arith.constant 0 : index
    %c0_3 = arith.constant 0 : index
    %5 = vector.load %arg4[%c0_2, %c0_3] : memref<256x768xbf16, #tpu.memory_space<vmem>>, vector<256x768xbf16>
    %cst = arith.constant dense<0.000000e+00> : vector<8x768xf32>
    %6 = tpu.matmul %4, %5, %cst {dimension_numbers = #tpu.dot_dimension_numbers<[1], [0], [0], [1], [0, 0, 1, 1], [], []>} : vector<8x256xbf16>, vector<256x768xbf16>, vector<8x768xf32> -> vector<8x768xf32>
    %c0_4 = arith.constant 0 : index
    %c0_5 = arith.constant 0 : index
    %7 = vector.load %arg5[%c0_4, %c0_5] : memref<1x768xf32, #tpu.memory_space<vmem>>, vector<1x768xf32>
    %8 = vector.broadcast %7 : vector<1x768xf32> to vector<8x768xf32>
    %9 = arith.addf %6, %8 : vector<8x768xf32>
    %c0_6 = arith.constant 0 : index
    %c0_7 = arith.constant 0 : index
    %10 = vector.load %arg1[%c0_6, %c0_7] : memref<8x1xi32, #tpu.memory_space<vmem>>, vector<8x1xi32>
    %c0_8 = arith.constant 0 : index
    %c0_9 = arith.constant 0 : index
    %c0_10 = arith.constant 0 : index
    %11 = vector.load %arg2[%c0_8, %c0_9, %c0_10] : memref<1x8x384xf32, #tpu.memory_space<vmem>>, vector<1x8x384xf32>
    %12 = vector.shape_cast %11 : vector<1x8x384xf32> to vector<8x384xf32>
    %13 = vector.extract_strided_slice %9 {offsets = [0, 0], sizes = [8, 384], strides = [1, 1]} : vector<8x768xf32> to vector<8x384xf32>
    %14 = vector.extract_strided_slice %3 {offsets = [0, 0], sizes = [8, 128], strides = [1, 1]} : vector<8x256xf32> to vector<8x128xf32>
    %15 = vector.extract_strided_slice %12 {offsets = [0, 0], sizes = [8, 128], strides = [1, 1]} : vector<8x384xf32> to vector<8x128xf32>
    %16 = vector.extract_strided_slice %13 {offsets = [0, 0], sizes = [8, 128], strides = [1, 1]} : vector<8x384xf32> to vector<8x128xf32>
    %17 = arith.addf %15, %16 : vector<8x128xf32>
    %18 = arith.negf %17 : vector<8x128xf32>
    %19 = math.exp %18 : vector<8x128xf32>
    %cst_11 = arith.constant 1.000000e+00 : f32
    %20 = vector.broadcast %cst_11 : f32 to vector<8x128xf32>
    %21 = arith.addf %20, %19 : vector<8x128xf32>
    %22 = arith.divf %20, %21 : vector<8x128xf32>
    %23 = vector.extract_strided_slice %12 {offsets = [0, 128], sizes = [8, 128], strides = [1, 1]} : vector<8x384xf32> to vector<8x128xf32>
    %24 = vector.extract_strided_slice %13 {offsets = [0, 128], sizes = [8, 128], strides = [1, 1]} : vector<8x384xf32> to vector<8x128xf32>
    %25 = arith.addf %23, %24 : vector<8x128xf32>
    %26 = arith.negf %25 : vector<8x128xf32>
    %27 = math.exp %26 : vector<8x128xf32>
    %cst_12 = arith.constant 1.000000e+00 : f32
    %28 = vector.broadcast %cst_12 : f32 to vector<8x128xf32>
    %29 = arith.addf %28, %27 : vector<8x128xf32>
    %30 = arith.divf %28, %29 : vector<8x128xf32>
    %31 = vector.extract_strided_slice %12 {offsets = [0, 256], sizes = [8, 128], strides = [1, 1]} : vector<8x384xf32> to vector<8x128xf32>
    %32 = vector.extract_strided_slice %13 {offsets = [0, 256], sizes = [8, 128], strides = [1, 1]} : vector<8x384xf32> to vector<8x128xf32>
    %33 = arith.mulf %22, %32 : vector<8x128xf32>
    %34 = arith.addf %31, %33 : vector<8x128xf32>
    %35 = math.tanh %34 : vector<8x128xf32>
    %cst_13 = arith.constant 1.000000e+00 : f32
    %36 = vector.broadcast %cst_13 : f32 to vector<8x128xf32>
    %37 = arith.subf %36, %30 : vector<8x128xf32>
    %38 = arith.mulf %37, %35 : vector<8x128xf32>
    %39 = arith.mulf %30, %14 : vector<8x128xf32>
    %40 = arith.addf %38, %39 : vector<8x128xf32>
    %41 = vector.broadcast %arg0 : i32 to vector<8x1xi32>
    %42 = arith.cmpi slt, %41, %10 : vector<8x1xi32>
    %43 = arith.extui %42 : vector<8x1xi1> to vector<8x1xi32>
    %44 = arith.sitofp %43 : vector<8x1xi32> to vector<8x1xf32>
    %45 = vector.broadcast %44 : vector<8x1xf32> to vector<8x128xf32>
    %46 = arith.mulf %45, %40 : vector<8x128xf32>
    %cst_14 = arith.constant 1.000000e+00 : f32
    %47 = vector.broadcast %cst_14 : f32 to vector<8x1xf32>
    %48 = arith.subf %47, %44 : vector<8x1xf32>
    %49 = vector.broadcast %48 : vector<8x1xf32> to vector<8x128xf32>
    %50 = arith.mulf %49, %14 : vector<8x128xf32>
    %51 = arith.addf %46, %50 : vector<8x128xf32>
    %c0_15 = arith.constant 0 : index
    %c0_16 = arith.constant 0 : index
    %c0_17 = arith.constant 0 : index
    %52 = vector.load %arg3[%c0_15, %c0_16, %c0_17] : memref<1x8x384xf32, #tpu.memory_space<vmem>>, vector<1x8x384xf32>
    %53 = vector.shape_cast %52 : vector<1x8x384xf32> to vector<8x384xf32>
    %54 = vector.extract_strided_slice %9 {offsets = [0, 384], sizes = [8, 384], strides = [1, 1]} : vector<8x768xf32> to vector<8x384xf32>
    %55 = vector.extract_strided_slice %3 {offsets = [0, 128], sizes = [8, 128], strides = [1, 1]} : vector<8x256xf32> to vector<8x128xf32>
    %56 = vector.extract_strided_slice %53 {offsets = [0, 0], sizes = [8, 128], strides = [1, 1]} : vector<8x384xf32> to vector<8x128xf32>
    %57 = vector.extract_strided_slice %54 {offsets = [0, 0], sizes = [8, 128], strides = [1, 1]} : vector<8x384xf32> to vector<8x128xf32>
    %58 = arith.addf %56, %57 : vector<8x128xf32>
    %59 = arith.negf %58 : vector<8x128xf32>
    %60 = math.exp %59 : vector<8x128xf32>
    %cst_18 = arith.constant 1.000000e+00 : f32
    %61 = vector.broadcast %cst_18 : f32 to vector<8x128xf32>
    %62 = arith.addf %61, %60 : vector<8x128xf32>
    %63 = arith.divf %61, %62 : vector<8x128xf32>
    %64 = vector.extract_strided_slice %53 {offsets = [0, 128], sizes = [8, 128], strides = [1, 1]} : vector<8x384xf32> to vector<8x128xf32>
    %65 = vector.extract_strided_slice %54 {offsets = [0, 128], sizes = [8, 128], strides = [1, 1]} : vector<8x384xf32> to vector<8x128xf32>
    %66 = arith.addf %64, %65 : vector<8x128xf32>
    %67 = arith.negf %66 : vector<8x128xf32>
    %68 = math.exp %67 : vector<8x128xf32>
    %cst_19 = arith.constant 1.000000e+00 : f32
    %69 = vector.broadcast %cst_19 : f32 to vector<8x128xf32>
    %70 = arith.addf %69, %68 : vector<8x128xf32>
    %71 = arith.divf %69, %70 : vector<8x128xf32>
    %72 = vector.extract_strided_slice %53 {offsets = [0, 256], sizes = [8, 128], strides = [1, 1]} : vector<8x384xf32> to vector<8x128xf32>
    %73 = vector.extract_strided_slice %54 {offsets = [0, 256], sizes = [8, 128], strides = [1, 1]} : vector<8x384xf32> to vector<8x128xf32>
    %74 = arith.mulf %63, %73 : vector<8x128xf32>
    %75 = arith.addf %72, %74 : vector<8x128xf32>
    %76 = math.tanh %75 : vector<8x128xf32>
    %cst_20 = arith.constant 1.000000e+00 : f32
    %77 = vector.broadcast %cst_20 : f32 to vector<8x128xf32>
    %78 = arith.subf %77, %71 : vector<8x128xf32>
    %79 = arith.mulf %78, %76 : vector<8x128xf32>
    %80 = arith.mulf %71, %55 : vector<8x128xf32>
    %81 = arith.addf %79, %80 : vector<8x128xf32>
    %c7_i32 = arith.constant 7 : i32
    %82 = arith.subi %c7_i32, %arg0 : i32
    %83 = vector.broadcast %82 : i32 to vector<8x1xi32>
    %84 = arith.cmpi slt, %83, %10 : vector<8x1xi32>
    %85 = arith.extui %84 : vector<8x1xi1> to vector<8x1xi32>
    %86 = arith.sitofp %85 : vector<8x1xi32> to vector<8x1xf32>
    %87 = vector.broadcast %86 : vector<8x1xf32> to vector<8x128xf32>
    %88 = arith.mulf %87, %81 : vector<8x128xf32>
    %cst_21 = arith.constant 1.000000e+00 : f32
    %89 = vector.broadcast %cst_21 : f32 to vector<8x1xf32>
    %90 = arith.subf %89, %86 : vector<8x1xf32>
    %91 = vector.broadcast %90 : vector<8x1xf32> to vector<8x128xf32>
    %92 = arith.mulf %91, %55 : vector<8x128xf32>
    %93 = arith.addf %88, %92 : vector<8x128xf32>
    %94 = tpu.concatenate %51, %93 in 1 : vector<8x128xf32>, vector<8x128xf32> -> vector<8x256xf32>
    %c0_22 = arith.constant 0 : index
    %c0_23 = arith.constant 0 : index
    %95 = vector.load %arg6[%c0_22, %c0_23] : memref<8x256xf32, #tpu.memory_space<vmem>>, vector<8x256xf32>
    tpu.vector_store %arg6[%c0_22, %c0_23], %94 {strides = array<i32>} : memref<8x256xf32, #tpu.memory_space<vmem>>, vector<8x256xf32>,
    return
  }
  func.func @transform_0(%arg0: i32) -> (i32, i32) {
    %c0_i32 = arith.constant 0 : i32
    %c0_i32_0 = arith.constant 0 : i32
    %c0_i32_1 = arith.constant 0 : i32
    return %c0_i32, %c0_i32_0 : i32, i32
  }
  func.func @transform_1(%arg0: i32) -> (i32, i32, i32) {
    %c0_i32 = arith.constant 0 : i32
    %c0_i32_0 = arith.constant 0 : i32
    %c0_i32_1 = arith.constant 0 : i32
    return %arg0, %c0_i32, %c0_i32_0 : i32, i32, i32
  }
  func.func @transform_2(%arg0: i32) -> (i32, i32, i32) {
    %c7_i32 = arith.constant 7 : i32
    %0 = arith.subi %c7_i32, %arg0 : i32
    %c0_i32 = arith.constant 0 : i32
    %c1_i32 = arith.constant 1 : i32
    %c0_i32_0 = arith.constant 0 : i32
    return %0, %c0_i32, %c1_i32 : i32, i32, i32
  }
  func.func @transform_3(%arg0: i32) -> (i32, i32) {
    %c0_i32 = arith.constant 0 : i32
    %c0_i32_0 = arith.constant 0 : i32
    %c0_i32_1 = arith.constant 0 : i32
    return %c0_i32, %c0_i32_0 : i32, i32
  }
  func.func @transform_4(%arg0: i32) -> (i32, i32) {
    %c0_i32 = arith.constant 0 : i32
    %c0_i32_0 = arith.constant 0 : i32
    %c0_i32_1 = arith.constant 0 : i32
    return %c0_i32, %c0_i32_0 : i32, i32
  }
  func.func @transform_5(%arg0: i32) -> (i32, i32) {
    %c0_i32 = arith.constant 0 : i32
    %c0_i32_0 = arith.constant 0 : i32
    %c0_i32_1 = arith.constant 0 : i32
    return %c0_i32, %c0_i32_0 : i32, i32
  }
}

module attributes {stable_mosaic.version = 11 : i64} {
  func.func @linear_kernel(%arg0: i32, %arg1: i32, %arg2: memref<8x256xf32, #tpu.memory_space<vmem>>, %arg3: memref<256x128xbf16, #tpu.memory_space<vmem>>, %arg4: memref<1x128xf32, #tpu.memory_space<vmem>>, %arg5: memref<8x128xf32, #tpu.memory_space<vmem>>) attributes {dimension_semantics = [#tpu.dimension_semantics<parallel>, #tpu.dimension_semantics<parallel>], iteration_bounds = array<i64: 1, 1>, scalar_prefetch = 0 : i64, scratch_operands = 0 : i64, tpu.core_type = #tpu.core_type<tc>, window_params = [{transform_indices = @transform_0, window_bounds = array<i64: 8, 256>}, {transform_indices = @transform_1, window_bounds = array<i64: 256, 128>}, {transform_indices = @transform_2, window_bounds = array<i64: 1, 128>}, {transform_indices = @transform_3, window_bounds = array<i64: 8, 128>}]} {
    %c0 = arith.constant 0 : index
    %c0_0 = arith.constant 0 : index
    %0 = vector.load %arg2[%c0, %c0_0] : memref<8x256xf32, #tpu.memory_space<vmem>>, vector<8x256xf32>
    %1 = arith.truncf %0 : vector<8x256xf32> to vector<8x256xbf16>
    %c0_1 = arith.constant 0 : index
    %c0_2 = arith.constant 0 : index
    %2 = vector.load %arg3[%c0_1, %c0_2] : memref<256x128xbf16, #tpu.memory_space<vmem>>, vector<256x128xbf16>
    %cst = arith.constant dense<0.000000e+00> : vector<8x128xf32>
    %3 = tpu.matmul %1, %2, %cst {dimension_numbers = #tpu.dot_dimension_numbers<[1], [0], [0], [1], [0, 0, 1, 1], [], []>} : vector<8x256xbf16>, vector<256x128xbf16>, vector<8x128xf32> -> vector<8x128xf32>
    %c0_3 = arith.constant 0 : index
    %c0_4 = arith.constant 0 : index
    %4 = vector.load %arg4[%c0_3, %c0_4] : memref<1x128xf32, #tpu.memory_space<vmem>>, vector<1x128xf32>
    %5 = vector.broadcast %4 : vector<1x128xf32> to vector<8x128xf32>
    %6 = arith.addf %3, %5 : vector<8x128xf32>
    %7 = math.tanh %6 : vector<8x128xf32>
    %c0_5 = arith.constant 0 : index
    %c0_6 = arith.constant 0 : index
    %8 = vector.load %arg5[%c0_5, %c0_6] : memref<8x128xf32, #tpu.memory_space<vmem>>, vector<8x128xf32>
    tpu.vector_store %arg5[%c0_5, %c0_6], %7 {strides = array<i32>} : memref<8x128xf32, #tpu.memory_space<vmem>>, vector<8x128xf32>,
    return
  }
  func.func @transform_0(%arg0: i32, %arg1: i32) -> (i32, i32) {
    %c0_i32 = arith.constant 0 : i32
    %c0_i32_0 = arith.constant 0 : i32
    return %arg0, %c0_i32 : i32, i32
  }
  func.func @transform_1(%arg0: i32, %arg1: i32) -> (i32, i32) {
    %c0_i32 = arith.constant 0 : i32
    %c0_i32_0 = arith.constant 0 : i32
    return %c0_i32, %arg1 : i32, i32
  }
  func.func @transform_2(%arg0: i32, %arg1: i32) -> (i32, i32) {
    %c0_i32 = arith.constant 0 : i32
    %c0_i32_0 = arith.constant 0 : i32
    return %c0_i32, %arg1 : i32, i32
  }
  func.func @transform_3(%arg0: i32, %arg1: i32) -> (i32, i32) {
    %c0_i32 = arith.constant 0 : i32
    return %arg0, %arg1 : i32, i32
  }
}

module attributes {stable_mosaic.version = 11 : i64} {
  func.func @linear_kernel(%arg0: i32, %arg1: i32, %arg2: memref<64x16xf32, #tpu.memory_space<vmem>>, %arg3: memref<16x384xbf16, #tpu.memory_space<vmem>>, %arg4: memref<1x384xf32, #tpu.memory_space<vmem>>, %arg5: memref<64x384xf32, #tpu.memory_space<vmem>>) attributes {dimension_semantics = [#tpu.dimension_semantics<parallel>, #tpu.dimension_semantics<parallel>], iteration_bounds = array<i64: 1, 1>, scalar_prefetch = 0 : i64, scratch_operands = 0 : i64, tpu.core_type = #tpu.core_type<tc>, window_params = [{transform_indices = @transform_0, window_bounds = array<i64: 64, 16>}, {transform_indices = @transform_1, window_bounds = array<i64: 16, 384>}, {transform_indices = @transform_2, window_bounds = array<i64: 1, 384>}, {transform_indices = @transform_3, window_bounds = array<i64: 64, 384>}]} {
    %c0 = arith.constant 0 : index
    %c0_0 = arith.constant 0 : index
    %0 = vector.load %arg2[%c0, %c0_0] : memref<64x16xf32, #tpu.memory_space<vmem>>, vector<64x16xf32>
    %1 = arith.truncf %0 : vector<64x16xf32> to vector<64x16xbf16>
    %c0_1 = arith.constant 0 : index
    %c0_2 = arith.constant 0 : index
    %2 = vector.load %arg3[%c0_1, %c0_2] : memref<16x384xbf16, #tpu.memory_space<vmem>>, vector<16x384xbf16>
    %cst = arith.constant dense<0.000000e+00> : vector<64x384xf32>
    %3 = tpu.matmul %1, %2, %cst {dimension_numbers = #tpu.dot_dimension_numbers<[1], [0], [0], [1], [0, 0, 1, 1], [], []>} : vector<64x16xbf16>, vector<16x384xbf16>, vector<64x384xf32> -> vector<64x384xf32>
    %c0_3 = arith.constant 0 : index
    %c0_4 = arith.constant 0 : index
    %4 = vector.load %arg4[%c0_3, %c0_4] : memref<1x384xf32, #tpu.memory_space<vmem>>, vector<1x384xf32>
    %5 = vector.broadcast %4 : vector<1x384xf32> to vector<64x384xf32>
    %6 = arith.addf %3, %5 : vector<64x384xf32>
    %c0_5 = arith.constant 0 : index
    %c0_6 = arith.constant 0 : index
    %7 = vector.load %arg5[%c0_5, %c0_6] : memref<64x384xf32, #tpu.memory_space<vmem>>, vector<64x384xf32>
    tpu.vector_store %arg5[%c0_5, %c0_6], %6 {strides = array<i32>} : memref<64x384xf32, #tpu.memory_space<vmem>>, vector<64x384xf32>,
    return
  }
  func.func @transform_0(%arg0: i32, %arg1: i32) -> (i32, i32) {
    %c0_i32 = arith.constant 0 : i32
    %c0_i32_0 = arith.constant 0 : i32
    return %arg0, %c0_i32 : i32, i32
  }
  func.func @transform_1(%arg0: i32, %arg1: i32) -> (i32, i32) {
    %c0_i32 = arith.constant 0 : i32
    %c0_i32_0 = arith.constant 0 : i32
    return %c0_i32, %arg1 : i32, i32
  }
  func.func @transform_2(%arg0: i32, %arg1: i32) -> (i32, i32) {
    %c0_i32 = arith.constant 0 : i32
    %c0_i32_0 = arith.constant 0 : i32
    return %c0_i32, %arg1 : i32, i32
  }
  func.func @transform_3(%arg0: i32, %arg1: i32) -> (i32, i32) {
    %c0_i32 = arith.constant 0 : i32
    return %arg0, %arg1 : i32, i32
  }
}

module attributes {stable_mosaic.version = 11 : i64} {
  func.func @gru_decoder_kernel(%arg0: i32, %arg1: memref<1x8x384xf32, #tpu.memory_space<vmem>>, %arg2: memref<128x384xbf16, #tpu.memory_space<vmem>>, %arg3: memref<1x384xf32, #tpu.memory_space<vmem>>, %arg4: memref<8x128xf32, #tpu.memory_space<vmem>>, %arg5: memref<1x8x128xf32, #tpu.memory_space<vmem>>, %arg6: memref<8x128xf32, #tpu.memory_space<vmem>>) attributes {dimension_semantics = [#tpu.dimension_semantics<arbitrary>], iteration_bounds = array<i64: 8>, scalar_prefetch = 0 : i64, scratch_operands = 1 : i64, tpu.core_type = #tpu.core_type<tc>, window_params = [{transform_indices = @transform_0, window_bounds = array<i64: 1, 8, 384>}, {pipeline_mode = #tpu.pipeline_mode<synchronous>, transform_indices = @transform_1, window_bounds = array<i64: 128, 384>}, {pipeline_mode = #tpu.pipeline_mode<synchronous>, transform_indices = @transform_2, window_bounds = array<i64: 1, 384>}, {pipeline_mode = #tpu.pipeline_mode<synchronous>, transform_indices = @transform_3, window_bounds = array<i64: 8, 128>}, {transform_indices = @transform_4, window_bounds = array<i64: 1, 8, 128>}]} {
    %c0_i32 = arith.constant 0 : i32
    %0 = arith.cmpi eq, %arg0, %c0_i32 : i32
    %1 = arith.extui %0 : i1 to i32
    %c0_i32_0 = arith.constant 0 : i32
    %2 = arith.cmpi ne, %1, %c0_i32_0 : i32
    scf.if %2 {
      %c0_17 = arith.constant 0 : index
      %c0_18 = arith.constant 0 : index
      %42 = vector.load %arg4[%c0_17, %c0_18] : memref<8x128xf32, #tpu.memory_space<vmem>>, vector<8x128xf32>
      %c0_19 = arith.constant 0 : index
      %c0_20 = arith.constant 0 : index
      %43 = vector.load %arg6[%c0_19, %c0_20] : memref<8x128xf32, #tpu.memory_space<vmem>>, vector<8x128xf32>
      tpu.vector_store %arg6[%c0_19, %c0_20], %42 {strides = array<i32>} : memref<8x128xf32, #tpu.memory_space<vmem>>, vector<8x128xf32>,
    } else {
    }
    %c0 = arith.constant 0 : index
    %c0_1 = arith.constant 0 : index
    %3 = vector.load %arg6[%c0, %c0_1] : memref<8x128xf32, #tpu.memory_space<vmem>>, vector<8x128xf32>
    %4 = arith.truncf %3 : vector<8x128xf32> to vector<8x128xbf16>
    %c0_2 = arith.constant 0 : index
    %c0_3 = arith.constant 0 : index
    %5 = vector.load %arg2[%c0_2, %c0_3] : memref<128x384xbf16, #tpu.memory_space<vmem>>, vector<128x384xbf16>
    %cst = arith.constant dense<0.000000e+00> : vector<8x384xf32>
    %6 = tpu.matmul %4, %5, %cst {dimension_numbers = #tpu.dot_dimension_numbers<[1], [0], [0], [1], [0, 0, 1, 1], [], []>} : vector<8x128xbf16>, vector<128x384xbf16>, vector<8x384xf32> -> vector<8x384xf32>
    %c0_4 = arith.constant 0 : index
    %c0_5 = arith.constant 0 : index
    %7 = vector.load %arg3[%c0_4, %c0_5] : memref<1x384xf32, #tpu.memory_space<vmem>>, vector<1x384xf32>
    %8 = vector.broadcast %7 : vector<1x384xf32> to vector<8x384xf32>
    %9 = arith.addf %6, %8 : vector<8x384xf32>
    %c0_6 = arith.constant 0 : index
    %c0_7 = arith.constant 0 : index
    %c0_8 = arith.constant 0 : index
    %10 = vector.load %arg1[%c0_6, %c0_7, %c0_8] : memref<1x8x384xf32, #tpu.memory_space<vmem>>, vector<1x8x384xf32>
    %11 = vector.shape_cast %10 : vector<1x8x384xf32> to vector<8x384xf32>
    %12 = vector.extract_strided_slice %11 {offsets = [0, 0], sizes = [8, 128], strides = [1, 1]} : vector<8x384xf32> to vector<8x128xf32>
    %13 = vector.extract_strided_slice %9 {offsets = [0, 0], sizes = [8, 128], strides = [1, 1]} : vector<8x384xf32> to vector<8x128xf32>
    %14 = arith.addf %12, %13 : vector<8x128xf32>
    %15 = arith.negf %14 : vector<8x128xf32>
    %16 = math.exp %15 : vector<8x128xf32>
    %cst_9 = arith.constant 1.000000e+00 : f32
    %17 = vector.broadcast %cst_9 : f32 to vector<8x128xf32>
    %18 = arith.addf %17, %16 : vector<8x128xf32>
    %19 = arith.divf %17, %18 : vector<8x128xf32>
    %20 = vector.extract_strided_slice %11 {offsets = [0, 128], sizes = [8, 128], strides = [1, 1]} : vector<8x384xf32> to vector<8x128xf32>
    %21 = vector.extract_strided_slice %9 {offsets = [0, 128], sizes = [8, 128], strides = [1, 1]} : vector<8x384xf32> to vector<8x128xf32>
    %22 = arith.addf %20, %21 : vector<8x128xf32>
    %23 = arith.negf %22 : vector<8x128xf32>
    %24 = math.exp %23 : vector<8x128xf32>
    %cst_10 = arith.constant 1.000000e+00 : f32
    %25 = vector.broadcast %cst_10 : f32 to vector<8x128xf32>
    %26 = arith.addf %25, %24 : vector<8x128xf32>
    %27 = arith.divf %25, %26 : vector<8x128xf32>
    %28 = vector.extract_strided_slice %11 {offsets = [0, 256], sizes = [8, 128], strides = [1, 1]} : vector<8x384xf32> to vector<8x128xf32>
    %29 = vector.extract_strided_slice %9 {offsets = [0, 256], sizes = [8, 128], strides = [1, 1]} : vector<8x384xf32> to vector<8x128xf32>
    %30 = arith.mulf %19, %29 : vector<8x128xf32>
    %31 = arith.addf %28, %30 : vector<8x128xf32>
    %32 = math.tanh %31 : vector<8x128xf32>
    %cst_11 = arith.constant 1.000000e+00 : f32
    %33 = vector.broadcast %cst_11 : f32 to vector<8x128xf32>
    %34 = arith.subf %33, %27 : vector<8x128xf32>
    %35 = arith.mulf %34, %32 : vector<8x128xf32>
    %36 = arith.mulf %27, %3 : vector<8x128xf32>
    %37 = arith.addf %35, %36 : vector<8x128xf32>
    %c0_12 = arith.constant 0 : index
    %c0_13 = arith.constant 0 : index
    %38 = vector.load %arg6[%c0_12, %c0_13] : memref<8x128xf32, #tpu.memory_space<vmem>>, vector<8x128xf32>
    tpu.vector_store %arg6[%c0_12, %c0_13], %37 {strides = array<i32>} : memref<8x128xf32, #tpu.memory_space<vmem>>, vector<8x128xf32>,
    %c0_14 = arith.constant 0 : index
    %c0_15 = arith.constant 0 : index
    %c0_16 = arith.constant 0 : index
    %39 = vector.load %arg5[%c0_14, %c0_15, %c0_16] : memref<1x8x128xf32, #tpu.memory_space<vmem>>, vector<1x8x128xf32>
    %40 = vector.shape_cast %39 : vector<1x8x128xf32> to vector<8x128xf32>
    %41 = vector.shape_cast %37 : vector<8x128xf32> to vector<1x8x128xf32>
    tpu.vector_store %arg5[%c0_14, %c0_15, %c0_16], %41 {strides = array<i32>} : memref<1x8x128xf32, #tpu.memory_space<vmem>>, vector<1x8x128xf32>,
    return
  }
  func.func @transform_0(%arg0: i32) -> (i32, i32, i32) {
    %c0_i32 = arith.constant 0 : i32
    %c0_i32_0 = arith.constant 0 : i32
    %c0_i32_1 = arith.constant 0 : i32
    return %arg0, %c0_i32, %c0_i32_0 : i32, i32, i32
  }
  func.func @transform_1(%arg0: i32) -> (i32, i32) {
    %c0_i32 = arith.constant 0 : i32
    %c0_i32_0 = arith.constant 0 : i32
    %c0_i32_1 = arith.constant 0 : i32
    return %c0_i32, %c0_i32_0 : i32, i32
  }
  func.func @transform_2(%arg0: i32) -> (i32, i32) {
    %c0_i32 = arith.constant 0 : i32
    %c0_i32_0 = arith.constant 0 : i32
    %c0_i32_1 = arith.constant 0 : i32
    return %c0_i32, %c0_i32_0 : i32, i32
  }
  func.func @transform_3(%arg0: i32) -> (i32, i32) {
    %c0_i32 = arith.constant 0 : i32
    %c0_i32_0 = arith.constant 0 : i32
    %c0_i32_1 = arith.constant 0 : i32
    return %c0_i32, %c0_i32_0 : i32, i32
  }
  func.func @transform_4(%arg0: i32) -> (i32, i32, i32) {
    %c0_i32 = arith.constant 0 : i32
    %c0_i32_0 = arith.constant 0 : i32
    %c0_i32_1 = arith.constant 0 : i32
    return %arg0, %c0_i32, %c0_i32_0 : i32, i32, i32
  }
}

module attributes {stable_mosaic.version = 11 : i64} {
  func.func @linear_kernel(%arg0: i32, %arg1: i32, %arg2: memref<64x128xf32, #tpu.memory_space<vmem>>, %arg3: memref<128x128xbf16, #tpu.memory_space<vmem>>, %arg4: memref<1x128xf32, #tpu.memory_space<vmem>>, %arg5: memref<64x128xf32, #tpu.memory_space<vmem>>) attributes {dimension_semantics = [#tpu.dimension_semantics<parallel>, #tpu.dimension_semantics<parallel>], iteration_bounds = array<i64: 1, 1>, scalar_prefetch = 0 : i64, scratch_operands = 0 : i64, tpu.core_type = #tpu.core_type<tc>, window_params = [{transform_indices = @transform_0, window_bounds = array<i64: 64, 128>}, {transform_indices = @transform_1, window_bounds = array<i64: 128, 128>}, {transform_indices = @transform_2, window_bounds = array<i64: 1, 128>}, {transform_indices = @transform_3, window_bounds = array<i64: 64, 128>}]} {
    %c0 = arith.constant 0 : index
    %c0_0 = arith.constant 0 : index
    %0 = vector.load %arg2[%c0, %c0_0] : memref<64x128xf32, #tpu.memory_space<vmem>>, vector<64x128xf32>
    %1 = arith.truncf %0 : vector<64x128xf32> to vector<64x128xbf16>
    %c0_1 = arith.constant 0 : index
    %c0_2 = arith.constant 0 : index
    %2 = vector.load %arg3[%c0_1, %c0_2] : memref<128x128xbf16, #tpu.memory_space<vmem>>, vector<128x128xbf16>
    %cst = arith.constant dense<0.000000e+00> : vector<64x128xf32>
    %3 = tpu.matmul %1, %2, %cst {dimension_numbers = #tpu.dot_dimension_numbers<[1], [0], [0], [1], [0, 0, 1, 1], [], []>} : vector<64x128xbf16>, vector<128x128xbf16>, vector<64x128xf32> -> vector<64x128xf32>
    %c0_3 = arith.constant 0 : index
    %c0_4 = arith.constant 0 : index
    %4 = vector.load %arg4[%c0_3, %c0_4] : memref<1x128xf32, #tpu.memory_space<vmem>>, vector<1x128xf32>
    %5 = vector.broadcast %4 : vector<1x128xf32> to vector<64x128xf32>
    %6 = arith.addf %3, %5 : vector<64x128xf32>
    %c0_5 = arith.constant 0 : index
    %c0_6 = arith.constant 0 : index
    %7 = vector.load %arg5[%c0_5, %c0_6] : memref<64x128xf32, #tpu.memory_space<vmem>>, vector<64x128xf32>
    tpu.vector_store %arg5[%c0_5, %c0_6], %6 {strides = array<i32>} : memref<64x128xf32, #tpu.memory_space<vmem>>, vector<64x128xf32>,
    return
  }
  func.func @transform_0(%arg0: i32, %arg1: i32) -> (i32, i32) {
    %c0_i32 = arith.constant 0 : i32
    %c0_i32_0 = arith.constant 0 : i32
    return %arg0, %c0_i32 : i32, i32
  }
  func.func @transform_1(%arg0: i32, %arg1: i32) -> (i32, i32) {
    %c0_i32 = arith.constant 0 : i32
    %c0_i32_0 = arith.constant 0 : i32
    return %c0_i32, %arg1 : i32, i32
  }
  func.func @transform_2(%arg0: i32, %arg1: i32) -> (i32, i32) {
    %c0_i32 = arith.constant 0 : i32
    %c0_i32_0 = arith.constant 0 : i32
    return %c0_i32, %arg1 : i32, i32
  }
  func.func @transform_3(%arg0: i32, %arg1: i32) -> (i32, i32) {
    %c0_i32 = arith.constant 0 : i32
    return %arg0, %arg1 : i32, i32
  }
}

</mosaic_0001>

<bundles_post_ra>
// kernel: _ae_mapper_forward.6
= control target key start
LH: loop header
LB: loop body
LE: loop exit
PB: predicated region body
PF: predicated region fallthrough
CT: control target
= control target key end

     0   :  { %v409_v1 = vmov 0   ;;  %vm95_vm0 = vcmask 130048   ;;  %v35_v19 = vlaneseq  ;;  %s671_s1 = inlined_call_operand.vmem [shape: bf16[16,768], index: 1, kind: input, shape index: {}]   ;;  %s672_s0 = inlined_call_operand.vmem [shape: f32[64,16], index: 0, kind: input, shape index: {}]   ;;  %s673_s2 = inlined_call_operand.vmem [shape: f32[1,768], index: 2, kind: input, shape index: {}]   ;;  %s674_s3 = inlined_call_operand.vmem [shape: f32[64,768], index: 3, kind: output, shape index: {}]  }
   0x1   :  { %v400_v0 = vld [vmem:[%s671_s1 + $0x4] ss:$24 sps:$4 sm:$0xff]   ;;  %140 = vmatprep.mubr.bf16.mxu0 %v409_v1  ;;  %160 = vmatprep.mubr.bf16.mxu1 %v409_v1  ;;  %v402_v2 = vld [vmem:[%s671_s1] ss:$24 sps:$4 sm:$0xff]   ;;  %v16_v4 = vld [vmem:[%s672_s0 + $0x8] sm:$0xff] }
   0x2   :  { %v15_v3 = vld [vmem:[%s672_s0] sm:$0xff]  ;;  %122 = vmatprep.subr.bf16.mxu0 %v400_v0  ;;  %397 = vmatprep.subr.bf16.mxu1 %v400_v0  ;;  %v20_v7 = vld [vmem:[%s672_s0 + $0x28] sm:$0xff]  ;;  %v17_v13 = vld [vmem:[%s672_s0 + $0x10] sm:$0xff]  ;;  %v36_v20 = vshrl.u32 %v35_v19, 7 }
   0x3   :  { %v23_v5 = vpack.c.bf16 %v16_v4, %v15_v3  ;;  %v19_v6 = vld [vmem:[%s672_s0 + $0x20] sm:$0xff]  ;;  %123 = vmatpush1.bf16.msra.mxu0 %v402_v2  ;;  %398 = vmatpush1.bf16.msra.mxu1 %v402_v2  ;;  %v406_v11 = vld [vmem:[%s671_s1 + $0x10] ss:$24 sps:$4 sm:$0xff]   ;;  %v408_v12 = vld [vmem:[%s671_s1 + $0x14] ss:$24 sps:$4 sm:$0xff]  }
   0x4   :  { %v25_v8 = vpack.c.bf16 %v20_v7, %v19_v6  ;;  %v403_v9 = vld [vmem:[%s671_s1 + $0x8] ss:$24 sps:$4 sm:$0xff]   ;;  %v405_v10 = vld [vmem:[%s671_s1 + $0xc] ss:$24 sps:$4 sm:$0xff]   ;;  %268 = vmatprep.subr.bf16.mxu0 %v408_v12  ;;  %v18_v14 = vld [vmem:[%s672_s0 + $0x18] sm:$0xff]  ;;  %v37_v21 = vsub.s32 0, %v36_v20 }
   0x5   :  { %195 = vmatprep.subr.bf16.mxu1 %v405_v10  ;;  %v21_v15 = vld [vmem:[%s672_s0 + $0x30] sm:$0xff]  ;;  %v22_v16 = vld [vmem:[%s672_s0 + $0x38] sm:$0xff]  ;;  %v24_v17 = vpack.c.bf16 %v18_v14, %v17_v13  ;;  %v33_v22 = vld [vmem:[%s673_s2] sm:$0x3f]  ;;  %v41_v23 = vsub.s32 1, %v36_v20  ;;  %v45_v46 = vsub.s32 2, %v36_v20 }
   0x6   :  { %385 = vmatmul.mubr.msk.bf16.vlgmr.msra.gmra.mxu0 %vm95_vm0, %v23_v5  ;;  %387 = vmatmul.mubr.msk.bf16.vlgmr.msra.gmra.mxu1 %vm95_vm0, %v25_v8  ;;  %v26_v18 = vpack.c.bf16 %v22_v16, %v21_v15  ;;  %v38_v24 = vrot.slane %v33_v22, %v37_v21  ;;  %v53_v47 = vsub.s32 4, %v36_v20  ;;  %v49_v52 = vsub.s32 3, %v36_v20 }
   0x7   :  { %196 = vmatpush1.bf16.msra.mxu1 %v403_v9  ;;  %269 = vmatpush1.bf16.msra.mxu0 %v406_v11  ;;  %v42_v25 = vrot.slane %v33_v22, %v41_v23  ;;  %v57_v53 = vsub.s32 5, %v36_v20  ;;  %v523_v58 = vrot.slane %v33_v22, %v45_v46 }
   0x8   :  { %150 = vmatprep.mubr.bf16.mxu0 %v409_v1  ;;  %170 = vmatprep.mubr.bf16.mxu1 %v409_v1  ;;  %v525_v59 = vrot.slane %v33_v22, %v53_v47  ;;  %v533_v0 = vrot.slane %v33_v22, %v49_v52 }
   0xe   :  { %386 = vmatmul.mubr.msk.bf16.gmra.mxu0 %vm95_vm0, %v24_v17  ;;  %388 = vmatmul.mubr.msk.bf16.gmra.mxu1 %vm95_vm0, %v26_v18 }
   0xf   :  { %213 = vmatprep.mubr.bf16.mxu1 %v409_v1  ;;  %286 = vmatprep.mubr.bf16.mxu0 %v409_v1 }
  0x16   :  { %389 = vmatmul.mubr.msk.bf16.vlgmr.msra.gmra.mxu1 %vm95_vm0, %v23_v5  ;;  %393 = vmatmul.mubr.msk.bf16.vlgmr.msra.gmra.mxu0 %vm95_vm0, %v23_v5 }
  0x17   :  { %223 = vmatprep.mubr.bf16.mxu1 %v409_v1  ;;  %296 = vmatprep.mubr.bf16.mxu0 %v409_v1 }
  0x1e   :  { %390 = vmatmul.mubr.msk.bf16.gmra.mxu1 %vm95_vm0, %v24_v17  ;;  %394 = vmatmul.mubr.msk.bf16.gmra.mxu0 %vm95_vm0, %v24_v17 }
  0x1f   :  { %233 = vmatprep.mubr.bf16.mxu1 %v409_v1  ;;  %306 = vmatprep.mubr.bf16.mxu0 %v409_v1 }
  0x26   :  { %391 = vmatmul.mubr.msk.bf16.gmra.mxu1 %vm95_vm0, %v25_v8  ;;  %395 = vmatmul.mubr.msk.bf16.gmra.mxu0 %vm95_vm0, %v25_v8 }
  0x27   :  { %243 = vmatprep.mubr.bf16.mxu1 %v409_v1  ;;  %316 = vmatprep.mubr.bf16.mxu0 %v409_v1  ;;  %v535_v1 = vrot.slane %v33_v22, %v57_v53 }
  0x2e   :  { %392 = vmatmul.mubr.msk.bf16.gmra.mxu1 %vm95_vm0, %v26_v18  ;;  %396 = vmatmul.mubr.msk.bf16.gmra.mxu0 %vm95_vm0, %v26_v18 }
  0xc6   :  { %v142_v26 = vpop.f32.mrf.mxu0  ;;  %v162_v27 = vpop.f32.mrf.mxu1 }
  0xc7   :  { %v143_v28 = vadd.f32 %v142_v26, %v38_v24  ;;  %v163_v29 = vadd.f32 %v162_v27, %v38_v24 }
  0xc8   :  { %v144_v30 = vpop.f32.mrf.mxu0  ;;  %v164_v31 = vpop.f32.mrf.mxu1 }
  0xc9   :  { %327 = vst [vmem:[%s674_s3] sm:$0xff] %v143_v28  ;;  %351 = vst [vmem:[%s674_s3 + $0xc0] sm:$0xff] %v163_v29  ;;  %v145_v32 = vadd.f32 %v144_v30, %v42_v25  ;;  %v165_v33 = vadd.f32 %v164_v31, %v42_v25 }
  0xca   :  { %v146_v34 = vpop.f32.mrf.mxu0  ;;  %v166_v35 = vpop.f32.mrf.mxu1 }
  0xcb   :  { %328 = vst [vmem:[%s674_s3 + $0x8] sm:$0xff] %v145_v32  ;;  %352 = vst [vmem:[%s674_s3 + $0xc8] sm:$0xff] %v165_v33  ;;  %v147_v36 = vadd.f32 %v146_v34, %v38_v24  ;;  %v167_v37 = vadd.f32 %v166_v35, %v38_v24 }
  0xcc   :  { %v148_v38 = vpop.f32.mrf.mxu0  ;;  %v168_v39 = vpop.f32.mrf.mxu1 }
  0xcd   :  { %333 = vst [vmem:[%s674_s3 + $0x30] sm:$0xff] %v147_v36  ;;  %357 = vst [vmem:[%s674_s3 + $0xf0] sm:$0xff] %v167_v37  ;;  %v149_v40 = vadd.f32 %v148_v38, %v42_v25  ;;  %v169_v41 = vadd.f32 %v168_v39, %v42_v25 }
  0xce   :  { %v152_v42 = vpop.f32.mrf.mxu0  ;;  %v172_v43 = vpop.f32.mrf.mxu1 }
  0xcf   :  { %334 = vst [vmem:[%s674_s3 + $0x38] sm:$0xff] %v149_v40  ;;  %358 = vst [vmem:[%s674_s3 + $0xf8] sm:$0xff] %v169_v41  ;;  %v153_v44 = vadd.f32 %v152_v42, %v38_v24  ;;  %v173_v45 = vadd.f32 %v172_v43, %v38_v24 }
  0xd0   :  { %v154_v48 = vpop.f32.mrf.mxu0  ;;  %v174_v49 = vpop.f32.mrf.mxu1 }
  0xd1   :  { %339 = vst [vmem:[%s674_s3 + $0x60] sm:$0xff] %v153_v44  ;;  %363 = vst [vmem:[%s674_s3 + $0x120] sm:$0xff] %v173_v45  ;;  %v155_v50 = vadd.f32 %v154_v48, %v42_v25  ;;  %v175_v51 = vadd.f32 %v174_v49, %v42_v25 }
  0xd2   :  { %v156_v54 = vpop.f32.mrf.mxu0  ;;  %v176_v55 = vpop.f32.mrf.mxu1 }
  0xd3   :  { %340 = vst [vmem:[%s674_s3 + $0x68] sm:$0xff] %v155_v50  ;;  %364 = vst [vmem:[%s674_s3 + $0x128] sm:$0xff] %v175_v51  ;;  %v157_v56 = vadd.f32 %v156_v54, %v38_v24  ;;  %v177_v57 = vadd.f32 %v176_v55, %v38_v24 }
  0xd4   :  { %v158_v60 = vpop.f32.mrf.mxu0  ;;  %v178_v61 = vpop.f32.mrf.mxu1 }
  0xd5   :  { %345 = vst [vmem:[%s674_s3 + $0x90] sm:$0xff] %v157_v56  ;;  %369 = vst [vmem:[%s674_s3 + $0x150] sm:$0xff] %v177_v57  ;;  %v159_v62 = vadd.f32 %v158_v60, %v42_v25  ;;  %v179_v63 = vadd.f32 %v178_v61, %v42_v25 }
  0xd6   :  { %v215_v2 = vpop.f32.mrf.mxu1  ;;  %v288_v3 = vpop.f32.mrf.mxu0 }
  0xd7   :  { %346 = vst [vmem:[%s674_s3 + $0x98] sm:$0xff] %v159_v62  ;;  %370 = vst [vmem:[%s674_s3 + $0x158] sm:$0xff] %v179_v63  ;;  %v216_v4 = vadd.f32 %v215_v2, %v523_v58  ;;  %v289_v5 = vadd.f32 %v288_v3, %v525_v59 }
  0xd8   :  { %v217_v6 = vpop.f32.mrf.mxu1  ;;  %v290_v7 = vpop.f32.mrf.mxu0 }
  0xd9   :  { %329 = vst [vmem:[%s674_s3 + $0x10] sm:$0xff] %v216_v4  ;;  %331 = vst [vmem:[%s674_s3 + $0x20] sm:$0xff] %v289_v5  ;;  %v218_v8 = vadd.f32 %v217_v6, %v533_v0  ;;  %v291_v9 = vadd.f32 %v290_v7, %v535_v1 }
  0xda   :  { %v219_v10 = vpop.f32.mrf.mxu1  ;;  %v292_v11 = vpop.f32.mrf.mxu0 }
  0xdb   :  { %330 = vst [vmem:[%s674_s3 + $0x18] sm:$0xff] %v218_v8  ;;  %332 = vst [vmem:[%s674_s3 + $0x28] sm:$0xff] %v291_v9  ;;  %v220_v12 = vadd.f32 %v219_v10, %v523_v58  ;;  %v293_v13 = vadd.f32 %v292_v11, %v525_v59 }
  0xdc   :  { %v221_v14 = vpop.f32.mrf.mxu1  ;;  %v294_v15 = vpop.f32.mrf.mxu0 }
  0xdd   :  { %335 = vst [vmem:[%s674_s3 + $0x40] sm:$0xff] %v220_v12  ;;  %337 = vst [vmem:[%s674_s3 + $0x50] sm:$0xff] %v293_v13  ;;  %v222_v16 = vadd.f32 %v221_v14, %v533_v0  ;;  %v295_v17 = vadd.f32 %v294_v15, %v535_v1 }
  0xde   :  { %v225_v18 = vpop.f32.mrf.mxu1  ;;  %v298_v19 = vpop.f32.mrf.mxu0 }
  0xdf   :  { %336 = vst [vmem:[%s674_s3 + $0x48] sm:$0xff] %v222_v16  ;;  %338 = vst [vmem:[%s674_s3 + $0x58] sm:$0xff] %v295_v17  ;;  %v226_v20 = vadd.f32 %v225_v18, %v523_v58  ;;  %v299_v21 = vadd.f32 %v298_v19, %v525_v59 }
  0xe0   :  { %v227_v22 = vpop.f32.mrf.mxu1  ;;  %v300_v23 = vpop.f32.mrf.mxu0 }
  0xe1   :  { %341 = vst [vmem:[%s674_s3 + $0x70] sm:$0xff] %v226_v20  ;;  %343 = vst [vmem:[%s674_s3 + $0x80] sm:$0xff] %v299_v21  ;;  %v228_v24 = vadd.f32 %v227_v22, %v533_v0  ;;  %v301_v25 = vadd.f32 %v300_v23, %v535_v1 }
  0xe2   :  { %v229_v26 = vpop.f32.mrf.mxu1  ;;  %v302_v27 = vpop.f32.mrf.mxu0 }
  0xe3   :  { %342 = vst [vmem:[%s674_s3 + $0x78] sm:$0xff] %v228_v24  ;;  %344 = vst [vmem:[%s674_s3 + $0x88] sm:$0xff] %v301_v25  ;;  %v230_v28 = vadd.f32 %v229_v26, %v523_v58  ;;  %v303_v29 = vadd.f32 %v302_v27, %v525_v59 }
  0xe4   :  { %v231_v30 = vpop.f32.mrf.mxu1  ;;  %v304_v31 = vpop.f32.mrf.mxu0 }
  0xe5   :  { %347 = vst [vmem:[%s674_s3 + $0xa0] sm:$0xff] %v230_v28  ;;  %349 = vst [vmem:[%s674_s3 + $0xb0] sm:$0xff] %v303_v29  ;;  %v232_v32 = vadd.f32 %v231_v30, %v533_v0  ;;  %v305_v33 = vadd.f32 %v304_v31, %v535_v1 }
  0xe6   :  { %v235_v34 = vpop.f32.mrf.mxu1  ;;  %v308_v35 = vpop.f32.mrf.mxu0 }
  0xe7   :  { %348 = vst [vmem:[%s674_s3 + $0xa8] sm:$0xff] %v232_v32  ;;  %350 = vst [vmem:[%s674_s3 + $0xb8] sm:$0xff] %v305_v33  ;;  %v236_v36 = vadd.f32 %v235_v34, %v523_v58  ;;  %v309_v37 = vadd.f32 %v308_v35, %v525_v59 }
  0xe8   :  { %v237_v38 = vpop.f32.mrf.mxu1  ;;  %v310_v39 = vpop.f32.mrf.mxu0 }
  0xe9   :  { %353 = vst [vmem:[%s674_s3 + $0xd0] sm:$0xff] %v236_v36  ;;  %355 = vst [vmem:[%s674_s3 + $0xe0] sm:$0xff] %v309_v37  ;;  %v238_v40 = vadd.f32 %v237_v38, %v533_v0  ;;  %v311_v41 = vadd.f32 %v310_v39, %v535_v1 }
  0xea   :  { %v239_v42 = vpop.f32.mrf.mxu1  ;;  %v312_v43 = vpop.f32.mrf.mxu0 }
  0xeb   :  { %354 = vst [vmem:[%s674_s3 + $0xd8] sm:$0xff] %v238_v40  ;;  %356 = vst [vmem:[%s674_s3 + $0xe8] sm:$0xff] %v311_v41  ;;  %v240_v44 = vadd.f32 %v239_v42, %v523_v58  ;;  %v313_v45 = vadd.f32 %v312_v43, %v525_v59 }
  0xec   :  { %v241_v46 = vpop.f32.mrf.mxu1  ;;  %v314_v47 = vpop.f32.mrf.mxu0 }
  0xed   :  { %359 = vst [vmem:[%s674_s3 + $0x100] sm:$0xff] %v240_v44  ;;  %361 = vst [vmem:[%s674_s3 + $0x110] sm:$0xff] %v313_v45  ;;  %v242_v48 = vadd.f32 %v241_v46, %v533_v0  ;;  %v315_v49 = vadd.f32 %v314_v47, %v535_v1 }
  0xee   :  { %v245_v50 = vpop.f32.mrf.mxu1  ;;  %v318_v51 = vpop.f32.mrf.mxu0 }
  0xef   :  { %360 = vst [vmem:[%s674_s3 + $0x108] sm:$0xff] %v242_v48  ;;  %362 = vst [vmem:[%s674_s3 + $0x118] sm:$0xff] %v315_v49  ;;  %v246_v52 = vadd.f32 %v245_v50, %v523_v58  ;;  %v319_v53 = vadd.f32 %v318_v51, %v525_v59 }
  0xf0   :  { %v247_v54 = vpop.f32.mrf.mxu1  ;;  %v320_v55 = vpop.f32.mrf.mxu0 }
  0xf1   :  { %365 = vst [vmem:[%s674_s3 + $0x130] sm:$0xff] %v246_v52  ;;  %367 = vst [vmem:[%s674_s3 + $0x140] sm:$0xff] %v319_v53  ;;  %v248_v56 = vadd.f32 %v247_v54, %v533_v0  ;;  %v321_v57 = vadd.f32 %v320_v55, %v535_v1 }
  0xf2   :  { %v249_v60 = vpop.f32.mrf.mxu1  ;;  %v322_v61 = vpop.f32.mrf.mxu0 }
  0xf3   :  { %366 = vst [vmem:[%s674_s3 + $0x138] sm:$0xff] %v248_v56  ;;  %368 = vst [vmem:[%s674_s3 + $0x148] sm:$0xff] %v321_v57  ;;  %v250_v62 = vadd.f32 %v249_v60, %v523_v58  ;;  %v323_v63 = vadd.f32 %v322_v61, %v525_v59 }
  0xf4   :  { %v251_v2 = vpop.f32.mrf.mxu1  ;;  %v324_v3 = vpop.f32.mrf.mxu0 }
  0xf5   :  { %371 = vst [vmem:[%s674_s3 + $0x160] sm:$0xff] %v250_v62  ;;  %373 = vst [vmem:[%s674_s3 + $0x170] sm:$0xff] %v323_v63  ;;  %v252_v4 = vadd.f32 %v251_v2, %v533_v0  ;;  %v325_v5 = vadd.f32 %v324_v3, %v535_v1 }
  0xf7   :  { %372 = vst [vmem:[%s674_s3 + $0x168] sm:$0xff] %v252_v4  ;;  %374 = vst [vmem:[%s674_s3 + $0x178] sm:$0xff] %v325_v5 }

// kernel: _ae_mapper_forward.8
= control target key start
LH: loop header
LB: loop body
LE: loop exit
PB: predicated region body
PF: predicated region fallthrough
CT: control target
= control target key end

     0   :  { %s337_s1 = inlined_call_operand.vmem [shape: bf16[256,128], index: 1, kind: input, shape index: {}]   ;;  %s338_s0 = inlined_call_operand.vmem [shape: f32[8,256], index: 0, kind: input, shape index: {}]   ;;  %s339_s2 = inlined_call_operand.vmem [shape: f32[1,128], index: 2, kind: input, shape index: {}]   ;;  %s340_s3 = inlined_call_operand.vmem [shape: f32[8,128], index: 3, kind: output, shape index: {}]  }
   0x1   :  { %v239_v0 = vld [vmem:[%s337_s1 + $0x78] sm:$0xff]   ;;  %v241_v2 = vld [vmem:[%s337_s1 + $0x70] sm:$0xff]   ;;  %v243_v4 = vld [vmem:[%s337_s1 + $0x68] sm:$0xff]  }
   0x2   :  { %v240_v1 = vld [vmem:[%s337_s1 + $0x38] sm:$0xff]   ;;  %217 = vmatprep.subr.bf16.mxu0 %v239_v0  ;;  %v242_v3 = vld [vmem:[%s337_s1 + $0x30] sm:$0xff]   ;;  %v244_v5 = vld [vmem:[%s337_s1 + $0x28] sm:$0xff]  }
   0x3   :  { %218 = vmatpush3.bf16.msra.mxu0 %v240_v1  ;;  %v245_v6 = vld [vmem:[%s337_s1 + $0x60] sm:$0xff]   ;;  %v247_v8 = vld [vmem:[%s337_s1 + $0x58] sm:$0xff]   ;;  %v249_v10 = vld [vmem:[%s337_s1 + $0x50] sm:$0xff]  }
   0x4   :  { %219 = vmatprep.subr.bf16.mxu0 %v241_v2  ;;  %v246_v7 = vld [vmem:[%s337_s1 + $0x20] sm:$0xff]   ;;  %v248_v9 = vld [vmem:[%s337_s1 + $0x18] sm:$0xff]   ;;  %v16_v11 = vld [vmem:[%s338_s0 + $0x8] sm:$0xff] }
   0x5   :  { %v18_v12 = vpack.c.bf16 %v16_v11, %v16_v11  ;;  %v250_v13 = vld [vmem:[%s337_s1 + $0x10] sm:$0xff]   ;;  %v251_v14 = vld [vmem:[%s337_s1 + $0x48] sm:$0xff]   ;;  %v253_v16 = vld [vmem:[%s337_s1 + $0x40] sm:$0xff]  }
   0x6   :  { %v252_v15 = vld [vmem:[%s337_s1 + $0x8] sm:$0xff]   ;;  %v254_v17 = vld [vmem:[%s337_s1] sm:$0xff]  }
   0x7   :  { %220 = vmatpush3.bf16.msra.mxu0 %v242_v3  ;;  %186 = vmatprep.mubr.bf16.mxu0 %v18_v12  ;;  %v15_v18 = vld [vmem:[%s338_s0] sm:$0xff] }
   0x8   :  { %221 = vmatprep.subr.bf16.mxu0 %v243_v4  ;;  %v17_v19 = vpack.c.bf16 %v15_v18, %v15_v18  ;;  %v200_v21 = vld [vmem:[%s339_s2] ss:$0 sm:$0xff] }
   0xb   :  { %222 = vmatpush3.bf16.msra.mxu0 %v244_v5 }
   0xc   :  { %223 = vmatprep.subr.bf16.mxu0 %v245_v6 }
   0xf   :  { %224 = vmatpush3.bf16.msra.mxu0 %v246_v7 }
  0x10   :  { %225 = vmatprep.subr.bf16.mxu0 %v247_v8 }
  0x13   :  { %226 = vmatpush3.bf16.msra.mxu0 %v248_v9 }
  0x14   :  { %227 = vmatprep.subr.bf16.mxu0 %v249_v10 }
  0x17   :  { %228 = vmatpush3.bf16.msra.mxu0 %v250_v13 }
  0x18   :  { %229 = vmatprep.subr.bf16.mxu0 %v251_v14 }
  0x1b   :  { %230 = vmatpush3.bf16.msra.mxu0 %v252_v15 }
  0x1c   :  { %231 = vmatprep.subr.bf16.mxu0 %v253_v16 }
  0x1f   :  { %232 = vmatpush3.bf16.msra.mxu0 %v254_v17 }
  0x22   :  { %187 = vmatmul.mubr.bf16.vlgmr.msra.gmra.mxu0 %v17_v19 }
  0xe2   :  { %v233_v20 = vpop.f32.mrf.mxu0 }
  0xe4   :  { %v234_v22 = vpop.f32.mrf.mxu0 }
  0xe5   :  { %v235_v23 = vadd.f32 %v234_v22, %v233_v20 }
  0xe6   :  { %v236_v24 = vpop.f32.mrf.mxu0 }
  0xe7   :  { %v189_v25 = vadd.f32 %v235_v23, %v200_v21 }
  0xe8   :  { %v237_v26 = vpop.f32.mrf.mxu0 }
  0xe9   :  { %255 = vtanh.f32 %v189_v25 }
  0xf6   :  { %v256_v27 = vpop.eup %255 }
  0xf7   :  { %195 = vst [vmem:[%s340_s3] sm:$0xff] %v256_v27 }

// kernel: _ae_mapper_forward.7
= control target key start
LH: loop header
LB: loop body
LE: loop exit
PB: predicated region body
PF: predicated region fallthrough
CT: control target
= control target key end

     0   :  { %s1453_s18 = smov 0   ;;  %s1842_s0 = inlined_call_operand.vmem [shape: s32[8,1], index: 0, kind: input, shape index: {}]   ;;  %s1843_s1 = inlined_call_operand.vmem [shape: f32[8,8,768], index: 1, kind: input, shape index: {}, may-alias: {1,2}]   ;;  %s1844_s2 = inlined_call_operand.vmem [shape: f32[8,8,768], index: 2, kind: input, shape index: {}, may-alias: {1,2}]   ;;  %s1845_s3 = inlined_call_operand.vmem [shape: bf16[256,768], index: 3, kind: input, shape index: {}]   ;;  %s1846_s4 = inlined_call_operand.vmem [shape: f32[1,768], index: 4, kind: input, shape index: {}]   ;;  %s1847_s5 = inlined_call_operand.vmem [shape: f32[8,256], index: 5, kind: output, shape index: {}]  }
   0x1 LB: > { %s1459_s19 = sadd.s32 4294967295, %s1418_s18   ;;  %p1118_p0 = scmp.ge.s32.totalorder %s1418_s18, 1  ;;  %s1418_s18 = sphi %s1453_s18, %s15_s18  }
   0x2   : > { %p197_p1 = scmp.lt.s32.totalorder %s1418_s18, 9 }
   0x4   : > { %p198_p2 = pnand %p1118_p0, %p197_p1 }
   0x5   : > { %p227_p3 = scmp.lt.s32.totalorder (!%p198_p2), %s1459_s19, 7  ;;  %s1465_s20 = ssub.s32 (!%p198_p2), 7, %s1459_s19 }
   0x6   : > { %201 = sbr.rel (%p198_p2) target bundleno = 391 (0x187), region = 40  ;;  %p233_p4 = scmp.lt.s32.totalorder (!%p198_p2), %s1465_s20, 7 }
   0x7   : > { %p1121_p5 = scmp.ne.s32.totalorder (!%p198_p2), %s1459_s19, 0 }
   0xb   : > { %s228_s21 = scalar_select %p227_p3, %s1459_s19, 7 }
   0xc   : > { %s234_s22 = scalar_select %p233_p4, %s1465_s20, 7 }
   0xd   : > { %s1229_s23 = smul.u32 48, %s228_s21 }
   0xe   : > { %s1120_s24 = smul.u32 48, %s234_s22 }
   0xf   : > { %s1473_s27 = scalar_lea.vmem %s1843_s1, %s1229_s23  ;;  %243 = sbr.rel (%p1121_p5) target bundleno = 22 (0x16), region = 44 }
  0x10   : > { %s1478_s30 = scalar_lea.vmem %s1844_s2, %s1120_s24 }
  0x14   : > { %v1420_v0 = vmov 0.0  }
  0x15   : > { %244 = vst [vmem:[%s1847_s5] sm:$0xff] %v1420_v0  ;;  %245 = vst [vmem:[%s1847_s5 + $0x8] sm:$0xff] %v1420_v0 }
  0x16 PF: > { %v1248_v1 = vld [vmem:[%s1845_s3 + $0x154] ss:$24 sps:$4 sm:$0xff]   ;;  %v1250_v2 = vld [vmem:[%s1845_s3 + $0x150] ss:$24 sps:$4 sm:$0xff]   ;;  %v1251_v3 = vld [vmem:[%s1845_s3 + $0x124] ss:$24 sps:$4 sm:$0xff]  }
  0x17   : > { %858 = vmatprep.subr.bf16.mxu0 %v1248_v1  ;;  %v1253_v4 = vld [vmem:[%s1845_s3 + $0x120] ss:$24 sps:$4 sm:$0xff]   ;;  %v1421_v5 = vmov 0   ;;  %v1254_v6 = vld [vmem:[%s1845_s3 + $0xf4] ss:$24 sps:$4 sm:$0xff]  }
  0x18   : > { %859 = vmatpush1.bf16.msra.mxu0 %v1250_v2  ;;  %1241 = vset.pattern.permute.xlu0 %v1421_v5  ;;  %v1256_v7 = vld [vmem:[%s1845_s3 + $0xf0] ss:$24 sps:$4 sm:$0xff]   ;;  %v1257_v8 = vld [vmem:[%s1845_s3 + $0xc4] ss:$24 sps:$4 sm:$0xff]   ;;  %v1259_v9 = vld [vmem:[%s1845_s3 + $0xc0] ss:$24 sps:$4 sm:$0xff]   ;;  %v1006_v2 = vstv %s1459_s19 }
  0x19   : > { %860 = vmatprep.subr.bf16.mxu0 %v1251_v3  ;;  %1247 = vset.pattern.permute.xlu1 %v1421_v5  ;;  %v1272_v10 = vld [vmem:[%s1845_s3 + $0x15c] ss:$24 sps:$4 sm:$0xff]   ;;  %v1274_v11 = vld [vmem:[%s1845_s3 + $0x158] ss:$24 sps:$4 sm:$0xff]   ;;  %v1278_v13 = vld [vmem:[%s1845_s3 + $0x12c] ss:$24 sps:$4 sm:$0xff]   ;;  %v1049_v5 = vstv %s1465_s20 }
  0x1a   : > { %v1260_v12 = vld [vmem:[%s1845_s3 + $0x94] ss:$24 sps:$4 sm:$0xff]   ;;  %899 = vmatprep.subr.bf16.mxu1 %v1272_v10  ;;  %v1280_v14 = vld [vmem:[%s1845_s3 + $0x128] ss:$24 sps:$4 sm:$0xff]   ;;  %v1263_v16 = vld [vmem:[%s1845_s3 + $0x64] ss:$24 sps:$4 sm:$0xff]  }
  0x1b   : > { %900 = vmatpush1.bf16.msra.mxu1 %v1274_v11  ;;  %v1262_v15 = vld [vmem:[%s1845_s3 + $0x90] ss:$24 sps:$4 sm:$0xff]   ;;  %v1284_v17 = vld [vmem:[%s1845_s3 + $0xfc] ss:$24 sps:$4 sm:$0xff]   ;;  %v1265_v19 = vld [vmem:[%s1845_s3 + $0x60] ss:$24 sps:$4 sm:$0xff]  }
  0x1c   : > { %861 = vmatpush1.bf16.msra.mxu0 %v1253_v4  ;;  %901 = vmatprep.subr.bf16.mxu1 %v1278_v13  ;;  %v1286_v18 = vld [vmem:[%s1845_s3 + $0xf8] ss:$24 sps:$4 sm:$0xff]   ;;  %v1290_v20 = vld [vmem:[%s1845_s3 + $0xcc] ss:$24 sps:$4 sm:$0xff]   ;;  %v1292_v22 = vld [vmem:[%s1845_s3 + $0xc8] ss:$24 sps:$4 sm:$0xff]  }
  0x1d   : > { %862 = vmatprep.subr.bf16.mxu0 %v1254_v6  ;;  %v1266_v21 = vld [vmem:[%s1845_s3 + $0x34] ss:$24 sps:$4 sm:$0xff]   ;;  %v1268_v23 = vld [vmem:[%s1845_s3 + $0x30] ss:$24 sps:$4 sm:$0xff]   ;;  %v1269_v25 = vld [vmem:[%s1845_s3 + $0x4] ss:$24 sps:$4 sm:$0xff]  }
  0x1e   : > { %v1296_v24 = vld [vmem:[%s1845_s3 + $0x9c] ss:$24 sps:$4 sm:$0xff]   ;;  %v1298_v26 = vld [vmem:[%s1845_s3 + $0x98] ss:$24 sps:$4 sm:$0xff]   ;;  %v1302_v28 = vld [vmem:[%s1845_s3 + $0x6c] ss:$24 sps:$4 sm:$0xff]  }
  0x1f   : > { %902 = vmatpush1.bf16.msra.mxu1 %v1280_v14  ;;  %v1271_v27 = vld [vmem:[%s1845_s3] ss:$24 sps:$4 sm:$0xff]   ;;  %v1275_v29 = vld [vmem:[%s1845_s3 + $0x2d4] ss:$24 sps:$4 sm:$0xff]   ;;  %v1277_v31 = vld [vmem:[%s1845_s3 + $0x2d0] ss:$24 sps:$4 sm:$0xff]  }
  0x20   : > { %863 = vmatpush1.bf16.msra.mxu0 %v1256_v7  ;;  %903 = vmatprep.subr.bf16.mxu1 %v1284_v17  ;;  %v1304_v30 = vld [vmem:[%s1845_s3 + $0x68] ss:$24 sps:$4 sm:$0xff]   ;;  %v1308_v32 = vld [vmem:[%s1845_s3 + $0x3c] ss:$24 sps:$4 sm:$0xff]   ;;  %v1310_v36 = vld [vmem:[%s1845_s3 + $0x38] ss:$24 sps:$4 sm:$0xff]  }
  0x21   : > { %864 = vmatprep.subr.bf16.mxu0 %v1257_v8  ;;  %v1281_v33 = vld [vmem:[%s1845_s3 + $0x2a4] ss:$24 sps:$4 sm:$0xff]   ;;  %v1283_v34 = vld [vmem:[%s1845_s3 + $0x2a0] ss:$24 sps:$4 sm:$0xff]   ;;  %v1589_v35 = vld [vmem:[%s1847_s5 + $0x8] sm:$0xff]  ;;  %v1422_v10 = vmov 0.0  }
  0x22   : > { %v1596_v37 = vpack.c.bf16 %v1589_v35, %v1589_v35  ;;  %v1314_v38 = vld [vmem:[%s1845_s3 + $0xc] ss:$24 sps:$4 sm:$0xff]   ;;  %v1289_v40 = vld [vmem:[%s1845_s3 + $0x270] ss:$24 sps:$4 sm:$0xff]   ;;  %v1320_v42 = vld [vmem:[%s1845_s3 + $0x2dc] ss:$24 sps:$4 sm:$0xff]  }
  0x23   : > { %904 = vmatpush1.bf16.msra.mxu1 %v1286_v18  ;;  %v1287_v39 = vld [vmem:[%s1845_s3 + $0x274] ss:$24 sps:$4 sm:$0xff]   ;;  %v1316_v41 = vld [vmem:[%s1845_s3 + $0x8] ss:$24 sps:$4 sm:$0xff]   ;;  %v1293_v43 = vld [vmem:[%s1845_s3 + $0x244] ss:$24 sps:$4 sm:$0xff]  }
  0x24   : > { %865 = vmatpush1.bf16.msra.mxu0 %v1259_v9  ;;  %905 = vmatprep.subr.bf16.mxu1 %v1290_v20  ;;  %v1295_v44 = vld [vmem:[%s1845_s3 + $0x240] ss:$24 sps:$4 sm:$0xff]   ;;  %v1326_v46 = vld [vmem:[%s1845_s3 + $0x2ac] ss:$24 sps:$4 sm:$0xff]   ;;  %v1301_v48 = vld [vmem:[%s1845_s3 + $0x210] ss:$24 sps:$4 sm:$0xff]  }
  0x25   : > { %866 = vmatprep.subr.bf16.mxu0 %v1260_v12  ;;  %890 = vmatprep.mubr.bf16.mxu0 %v1596_v37  ;;  %v1322_v45 = vld [vmem:[%s1845_s3 + $0x2d8] ss:$24 sps:$4 sm:$0xff]   ;;  %v1299_v47 = vld [vmem:[%s1845_s3 + $0x214] ss:$24 sps:$4 sm:$0xff]   ;;  %v1328_v49 = vld [vmem:[%s1845_s3 + $0x2a8] ss:$24 sps:$4 sm:$0xff]  }
  0x26   : > { %931 = vmatprep.mubr.bf16.mxu1 %v1596_v37  ;;  %v1332_v50 = vld [vmem:[%s1845_s3 + $0x27c] ss:$24 sps:$4 sm:$0xff]   ;;  %v1307_v52 = vld [vmem:[%s1845_s3 + $0x1e0] ss:$24 sps:$4 sm:$0xff]   ;;  %v1338_v54 = vld [vmem:[%s1845_s3 + $0x24c] ss:$24 sps:$4 sm:$0xff]  }
  0x27   : > { %906 = vmatpush1.bf16.msra.mxu1 %v1292_v22  ;;  %v1305_v51 = vld [vmem:[%s1845_s3 + $0x1e4] ss:$24 sps:$4 sm:$0xff]   ;;  %v1334_v53 = vld [vmem:[%s1845_s3 + $0x278] ss:$24 sps:$4 sm:$0xff]   ;;  %v1311_v55 = vld [vmem:[%s1845_s3 + $0x1b4] ss:$24 sps:$4 sm:$0xff]  }
  0x28   : > { %867 = vmatpush1.bf16.msra.mxu0 %v1262_v15  ;;  %907 = vmatprep.subr.bf16.mxu1 %v1296_v24  ;;  %v1313_v56 = vld [vmem:[%s1845_s3 + $0x1b0] ss:$24 sps:$4 sm:$0xff]   ;;  %v1344_v58 = vld [vmem:[%s1845_s3 + $0x21c] ss:$24 sps:$4 sm:$0xff]   ;;  %v1319_v60 = vld [vmem:[%s1845_s3 + $0x180] ss:$24 sps:$4 sm:$0xff]  }
  0x29   : > { %868 = vmatprep.subr.bf16.mxu0 %v1263_v16  ;;  %v1340_v57 = vld [vmem:[%s1845_s3 + $0x248] ss:$24 sps:$4 sm:$0xff]   ;;  %v1317_v59 = vld [vmem:[%s1845_s3 + $0x184] ss:$24 sps:$4 sm:$0xff]   ;;  %v1346_v62 = vld [vmem:[%s1845_s3 + $0x218] ss:$24 sps:$4 sm:$0xff]  }
  0x2a   : > { %v1672_v61 = vld [vmem:[%s1847_s5] sm:$0xff]  ;;  %v1356_v6 = vld [vmem:[%s1845_s3 + $0x1bc] ss:$24 sps:$4 sm:$0xff]   ;;  %v1358_v9 = vld [vmem:[%s1845_s3 + $0x1b8] ss:$24 sps:$4 sm:$0xff]  }
  0x2b   : > { %908 = vmatpush1.bf16.msra.mxu1 %v1298_v26  ;;  %v1350_v63 = vld [vmem:[%s1845_s3 + $0x1ec] ss:$24 sps:$4 sm:$0xff]   ;;  %v1323_v1 = vld [vmem:[%s1845_s3 + $0x160] ss:$24 sps:$4 sm:$0xff]   ;;  %v1689_v3 = vpack.c.bf16 %v1672_v61, %v1672_v61  ;;  %v1329_v13 = vld [vmem:[%s1845_s3 + $0x130] ss:$24 sps:$4 sm:$0xff]  }
  0x2c   : > { %869 = vmatpush1.bf16.msra.mxu0 %v1265_v19  ;;  %909 = vmatprep.subr.bf16.mxu1 %v1302_v28  ;;  %v1325_v0 = vld [vmem:[%s1845_s3 + $0x164] ss:$24 sps:$4 sm:$0xff]   ;;  %v1352_v4 = vld [vmem:[%s1845_s3 + $0x1e8] ss:$24 sps:$4 sm:$0xff]   ;;  %v1331_v7 = vld [vmem:[%s1845_s3 + $0x134] ss:$24 sps:$4 sm:$0xff]  }
  0x2d   : > { %870 = vmatprep.subr.bf16.mxu0 %v1266_v21  ;;  %v981_v8 = vld [vmem:[%s1842_s0] sm:$0xff]  ;;  %v1343_v21 = vld [vmem:[%s1845_s3 + $0xd4] ss:$24 sps:$4 sm:$0xff]   ;;  %v1341_v22 = vld [vmem:[%s1845_s3 + $0xd0] ss:$24 sps:$4 sm:$0xff]  }
  0x2e   : > { %vm1007_vm0 = vcmp.lt.s32.totalorder %v1006_v2, %v981_v8  ;;  %vm1050_vm1 = vcmp.lt.s32.totalorder %v1049_v5, %v981_v8  ;;  %v1362_v14 = vld [vmem:[%s1845_s3 + $0x18c] ss:$24 sps:$4 sm:$0xff]   ;;  %v1364_v19 = vld [vmem:[%s1845_s3 + $0x188] ss:$24 sps:$4 sm:$0xff]  }
  0x2f   : > { %910 = vmatpush1.bf16.msra.mxu1 %v1304_v30  ;;  %v1220_v11 = vsel %vm1007_vm0, 1.0, %v1422_v10  ;;  %v1226_v12 = vsel %vm1050_vm1, 1.0, %v1422_v10  ;;  %v1337_v17 = vld [vmem:[%s1845_s3 + $0x104] ss:$24 sps:$4 sm:$0xff]   ;;  %v1335_v20 = vld [vmem:[%s1845_s3 + $0x100] ss:$24 sps:$4 sm:$0xff]  }
  0x30   : > { %871 = vmatpush1.bf16.msra.mxu0 %v1268_v23  ;;  %911 = vmatprep.subr.bf16.mxu1 %v1308_v32  ;;  %v1242_v15 = vpack.i.bf16 %v1226_v12, %v1220_v11  ;;  %v1059_v16 = vsub.f32 1.0, %v1226_v12  ;;  %v1016_v18 = vsub.f32 1.0, %v1220_v11  ;;  %v1349_v23 = vld [vmem:[%s1845_s3 + $0xa4] ss:$24 sps:$4 sm:$0xff]   ;;  %v1347_v24 = vld [vmem:[%s1845_s3 + $0xa0] ss:$24 sps:$4 sm:$0xff]  }
  0x31   : > { %872 = vmatprep.subr.bf16.mxu0 %v1269_v25  ;;  %v1355_v25 = vld [vmem:[%s1845_s3 + $0x74] ss:$24 sps:$4 sm:$0xff]   ;;  %v1353_v26 = vld [vmem:[%s1845_s3 + $0x70] ss:$24 sps:$4 sm:$0xff]   ;;  %v1359_v28 = vld [vmem:[%s1845_s3 + $0x40] ss:$24 sps:$4 sm:$0xff]  }
  0x32   : > { %1243 = vperm.xlu0 %1241, %v1242_v15   ;;  %1062 = vperm.xlu1 %1247, %v1059_v16   ;;  %v1365_v30 = vld [vmem:[%s1845_s3 + $0x10] ss:$24 sps:$4 sm:$0xff]   ;;  %v1368_v32 = vld [vmem:[%s1845_s3 + $0x2e0] ss:$24 sps:$4 sm:$0xff]  }
  0x33   : > { %912 = vmatpush1.bf16.msra.mxu1 %v1310_v36  ;;  %v1376_v36 = vld [vmem:[%s1845_s3 + $0x284] ss:$24 sps:$4 sm:$0xff]  }
  0x34   : > { %873 = vmatpush1.bf16.msra.mxu0 %v1271_v27  ;;  %913 = vmatprep.subr.bf16.mxu1 %v1314_v38  ;;  %v1361_v27 = vld [vmem:[%s1845_s3 + $0x44] ss:$24 sps:$4 sm:$0xff]   ;;  %v1379_v38 = vld [vmem:[%s1845_s3 + $0x254] ss:$24 sps:$4 sm:$0xff]  }
  0x35   : > { %874 = vmatprep.subr.bf16.mxu0 %v1275_v29  ;;  %v1367_v29 = vld [vmem:[%s1845_s3 + $0x14] ss:$24 sps:$4 sm:$0xff]  }
  0x36   : > { %1019 = vperm.xlu0 %1241, %v1016_v18   ;;  %v1221_v18 = vld [vmem:[%s1478_s30 + $0x18] sm:$0xff] }
  0x37   : > { %914 = vmatpush1.bf16.msra.mxu1 %v1316_v41  ;;  %v1380_v41 = vld [vmem:[%s1845_s3 + $0x220] ss:$24 sps:$4 sm:$0xff]  }
  0x38   : > { %875 = vmatpush2.bf16.msra.mxu0 %v1277_v31  ;;  %915 = vmatprep.subr.bf16.mxu1 %v1320_v42  ;;  %v1370_v31 = vld [vmem:[%s1845_s3 + $0x2e4] ss:$24 sps:$4 sm:$0xff]   ;;  %v1385_v42 = vld [vmem:[%s1845_s3 + $0x1f4] ss:$24 sps:$4 sm:$0xff]  }
  0x39   : > { %876 = vmatprep.subr.bf16.mxu0 %v1281_v33  ;;  %v1373_v33 = vld [vmem:[%s1845_s3 + $0x2b4] ss:$24 sps:$4 sm:$0xff]  }
  0x3b   : > { %916 = vmatpush2.bf16.msra.mxu1 %v1322_v45  ;;  %v1386_v45 = vld [vmem:[%s1845_s3 + $0x1c0] ss:$24 sps:$4 sm:$0xff]  }
  0x3c   : > { %877 = vmatpush2.bf16.msra.mxu0 %v1283_v34  ;;  %917 = vmatprep.subr.bf16.mxu1 %v1326_v46  ;;  %v1371_v34 = vld [vmem:[%s1845_s3 + $0x2b0] ss:$24 sps:$4 sm:$0xff]   ;;  %v1391_v46 = vld [vmem:[%s1845_s3 + $0x194] ss:$24 sps:$4 sm:$0xff]  }
  0x3d   : > { %878 = vmatprep.subr.bf16.mxu0 %v1287_v39  ;;  %v1377_v39 = vld [vmem:[%s1845_s3 + $0x250] ss:$24 sps:$4 sm:$0xff]  }
  0x3f   : > { %918 = vmatpush2.bf16.msra.mxu1 %v1328_v49 }
  0x40   : > { %879 = vmatpush2.bf16.msra.mxu0 %v1289_v40  ;;  %919 = vmatprep.subr.bf16.mxu1 %v1332_v50  ;;  %v1382_v40 = vld [vmem:[%s1845_s3 + $0x224] ss:$24 sps:$4 sm:$0xff]  }
  0x41   : > { %880 = vmatprep.subr.bf16.mxu0 %v1293_v43  ;;  %v1383_v43 = vld [vmem:[%s1845_s3 + $0x1f0] ss:$24 sps:$4 sm:$0xff]  }
  0x43   : > { %920 = vmatpush2.bf16.msra.mxu1 %v1334_v53 }
  0x44   : > { %881 = vmatpush2.bf16.msra.mxu0 %v1295_v44  ;;  %921 = vmatprep.subr.bf16.mxu1 %v1338_v54  ;;  %v1388_v44 = vld [vmem:[%s1845_s3 + $0x1c4] ss:$24 sps:$4 sm:$0xff]  }
  0x45   : > { %882 = vmatprep.subr.bf16.mxu0 %v1299_v47  ;;  %v1389_v47 = vld [vmem:[%s1845_s3 + $0x190] ss:$24 sps:$4 sm:$0xff]  }
  0x47   : > { %922 = vmatpush2.bf16.msra.mxu1 %v1340_v57 }
  0x48   : > { %883 = vmatpush2.bf16.msra.mxu0 %v1301_v48  ;;  %923 = vmatprep.subr.bf16.mxu1 %v1344_v58  ;;  %v348_v48 = vlaneseq }
  0x49   : > { %884 = vmatprep.subr.bf16.mxu0 %v1305_v51  ;;  %v1810_v51 = vld [vmem:[%s1846_s4] sm:$0x3f] }
  0x4a   : > { %v1804_v49 = vshrl.u32 %v348_v48, 7 }
  0x4b   : > { %924 = vmatpush2.bf16.msra.mxu1 %v1346_v62 }
  0x4c   : > { %885 = vmatpush2.bf16.msra.mxu0 %v1307_v52  ;;  %925 = vmatprep.subr.bf16.mxu1 %v1350_v63  ;;  %v350_v50 = vsub.s32 0, %v1804_v49  ;;  %v354_v53 = vsub.s32 1, %v1804_v49  ;;  %v358_v10 = vsub.s32 2, %v1804_v49  ;;  %v362_v11 = vsub.s32 3, %v1804_v49 }
  0x4d   : > { %886 = vmatprep.subr.bf16.mxu0 %v1311_v55  ;;  %v982_v55 = vld [vmem:[%s1473_s27] sm:$0xff]  ;;  %v370_v48 = vsub.s32 5, %v1804_v49 }
  0x4e   : > { %v351_v52 = vrot.slane %v1810_v51, %v350_v50  ;;  %v355_v57 = vrot.slane %v1810_v51, %v354_v53  ;;  %v359_v12 = vrot.slane %v1810_v51, %v358_v10 }
  0x4f   : > { %926 = vmatpush2.bf16.msra.mxu1 %v1352_v4 }
  0x50   : > { %887 = vmatpush2.bf16.msra.mxu0 %v1313_v56  ;;  %927 = vmatprep.subr.bf16.mxu1 %v1356_v6 }
  0x51   : > { %888 = vmatprep.subr.bf16.mxu0 %v1317_v59 }
  0x53   : > { %928 = vmatpush2.bf16.msra.mxu1 %v1358_v9 }
  0x54   : > { %889 = vmatpush2.bf16.msra.mxu0 %v1319_v60  ;;  %929 = vmatprep.subr.bf16.mxu1 %v1362_v14 }
  0x55   : > { %940 = vmatprep.subr.bf16.mxu0 %v1325_v0  ;;  %v983_v0 = vld [vmem:[%s1473_s27 + $0x8] sm:$0xff] }
  0x57   : > { %891 = vmatmul.mubr.bf16.vlgmr.msra.gmra.mxu0 %v1689_v3  ;;  %930 = vmatpush2.bf16.msra.mxu1 %v1364_v19 }
  0x58   : > { %941 = vmatpush1.bf16.msra.mxu0 %v1323_v1  ;;  %972 = vmatprep.mubr.bf16.mxu0 %v1596_v37  ;;  %v1374_v37 = vld [vmem:[%s1845_s3 + $0x280] ss:$24 sps:$4 sm:$0xff]  }
  0x59   : > { %942 = vmatprep.subr.bf16.mxu0 %v1331_v7 }
  0x5a   : > { %932 = vmatmul.mubr.bf16.vlgmr.msra.gmra.mxu1 %v1689_v3 }
  0x5c   : > { %943 = vmatpush1.bf16.msra.mxu0 %v1329_v13  ;;  %v363_v13 = vrot.slane %v1810_v51, %v362_v11 }
  0x5d   : > { %944 = vmatprep.subr.bf16.mxu0 %v1337_v17 }
  0x60   : > { %945 = vmatpush1.bf16.msra.mxu0 %v1335_v20  ;;  %v984_v20 = vld [vmem:[%s1473_s27 + $0x10] sm:$0xff] }
  0x61   : > { %946 = vmatprep.subr.bf16.mxu0 %v1343_v21 }
  0x64   : > { %947 = vmatpush1.bf16.msra.mxu0 %v1341_v22 }
  0x65   : > { %948 = vmatprep.subr.bf16.mxu0 %v1349_v23 }
  0x68   : > { %949 = vmatpush1.bf16.msra.mxu0 %v1347_v24 }
  0x69   : > { %950 = vmatprep.subr.bf16.mxu0 %v1355_v25 }
  0x6c   : > { %951 = vmatpush1.bf16.msra.mxu0 %v1353_v26 }
  0x6d   : > { %952 = vmatprep.subr.bf16.mxu0 %v1361_v27 }
  0x70   : > { %953 = vmatpush1.bf16.msra.mxu0 %v1359_v28 }
  0x71   : > { %954 = vmatprep.subr.bf16.mxu0 %v1367_v29 }
  0x74   : > { %955 = vmatpush1.bf16.msra.mxu0 %v1365_v30 }
  0x75   : > { %956 = vmatprep.subr.bf16.mxu0 %v1370_v31 }
  0x78   : > { %957 = vmatpush2.bf16.msra.mxu0 %v1368_v32 }
  0x79   : > { %958 = vmatprep.subr.bf16.mxu0 %v1373_v33 }
  0x7c   : > { %959 = vmatpush2.bf16.msra.mxu0 %v1371_v34 }
  0x7d   : > { %960 = vmatprep.subr.bf16.mxu0 %v1376_v36  ;;  %v366_v36 = vsub.s32 4, %v1804_v49 }
  0x80   : > { %961 = vmatpush2.bf16.msra.mxu0 %v1374_v37 }
  0x81   : > { %962 = vmatprep.subr.bf16.mxu0 %v1379_v38 }
  0x84   : > { %963 = vmatpush2.bf16.msra.mxu0 %v1377_v39 }
  0x85   : > { %964 = vmatprep.subr.bf16.mxu0 %v1382_v40 }
  0x88   : > { %965 = vmatpush2.bf16.msra.mxu0 %v1380_v41  ;;  %v367_v41 = vrot.slane %v1810_v51, %v366_v36 }
  0x89   : > { %966 = vmatprep.subr.bf16.mxu0 %v1385_v42 }
  0x8c   : > { %967 = vmatpush2.bf16.msra.mxu0 %v1383_v43  ;;  %v1222_v43 = vld [vmem:[%s1478_s30 + $0x20] sm:$0xff] }
  0x8d   : > { %968 = vmatprep.subr.bf16.mxu0 %v1388_v44 }
  0x90   : > { %969 = vmatpush2.bf16.msra.mxu0 %v1386_v45 }
  0x91   : > { %970 = vmatprep.subr.bf16.mxu0 %v1391_v46 }
  0x94   : > { %971 = vmatpush2.bf16.msra.mxu0 %v1389_v47 }
  0x97   : > { %973 = vmatmul.mubr.bf16.vlgmr.msra.gmra.mxu0 %v1689_v3 }
  0xad   : > { %v1244_v25 = vpop.permute.xlu0 %1243 }
  0xae   : > { %v1245_v30 = vunpack.i.l.bf16 %v1244_v25 }
  0xb1   : > { %v1020_v29 = vpop.permute.xlu0 %1019 }
  0xb2   : > { %v1022_v34 = vmul.f32 %v1020_v29, %v1672_v61 }
 0x117   : > { %v892_v54 = vpop.f32.mrf.mxu0 }
 0x118   : > { %v893_v56 = vadd.f32 %v892_v54, %v351_v52  ;;  %v371_v52 = vrot.slane %v1810_v51, %v370_v48 }
 0x119   : > { %v894_v58 = vpop.f32.mrf.mxu0 }
 0x11a   : > { %v985_v59 = vadd.f32 %v982_v55, %v893_v56  ;;  %v895_v63 = vadd.f32 %v894_v58, %v355_v57  ;;  %v933_v3 = vpop.f32.mrf.mxu1  ;;  %v1223_v56 = vld [vmem:[%s1478_s30 + $0x28] sm:$0xff] }
 0x11b   : > { %v896_v60 = vpop.f32.mrf.mxu0  ;;  %v934_v16 = vadd.f32 %v933_v3, %v359_v12 }
 0x11c   : > { %v1218_v62 = vmul.f32 -1.442695, %v985_v59  ;;  %v992_v2 = vadd.f32 %v983_v0, %v895_v63  ;;  %v935_v5 = vpop.f32.mrf.mxu1  ;;  %v1063_v0 = vpop.permute.xlu1 %1062 }
 0x11d   : > { %v897_v1 = vpop.f32.mrf.mxu0  ;;  %v936_v17 = vadd.f32 %v935_v5, %v363_v13  ;;  %v1065_v51 = vmul.f32 %v1063_v0, %v1589_v35 }
 0x11e   : > { %1392 = vpow2.f32 %v1218_v62  ;;  %v1219_v4 = vmul.f32 -1.442695, %v992_v2  ;;  %v937_v6 = vpop.f32.mrf.mxu1  ;;  %v1246_v2 = vunpack.i.h.bf16 %v1244_v25 }
 0x11f   : > { %v1027_v22 = vadd.f32 %v1221_v18, %v936_v17 }
 0x120   : > { %1394 = vpow2.f32 %v1219_v4  ;;  %v938_v7 = vpop.f32.mrf.mxu1 }
 0x121   : > { %v1224_v24 = vmul.f32 -1.442695, %v1027_v22 }
 0x12b   : > { %v1393_v8 = vpop.eup %1392 }
 0x12c   : > { %v989_v9 = vadd.f32 1.0, %v1393_v8 }
 0x12d   : > { %v1395_v14 = vpop.eup %1394 }
 0x12e   : > { %1396 = vrcp.f32 %v989_v9  ;;  %v996_v15 = vadd.f32 1.0, %v1395_v14 }
 0x130   : > { %1398 = vrcp.f32 %v996_v15 }
 0x13b   : > { %v1397_v19 = vpop.eup %1396 }
 0x13c   : > { %v999_v21 = vmul.f32 %v1397_v19, %v934_v16 }
 0x13d   : > { %v1399_v26 = vpop.eup %1398 }
 0x13e   : > { %v1000_v23 = vadd.f32 %v999_v21, %v984_v20  ;;  %v1002_v27 = vsub.f32 1.0, %v1399_v26  ;;  %v1004_v32 = vmul.f32 %v1399_v26, %v1672_v61 }
 0x140   : > { %1400 = vtanh.f32 %v1000_v23 }
 0x141   : > { %1402 = vpow2.f32 %v1224_v24 }
 0x14d   : > { %v1401_v28 = vpop.eup %1400 }
 0x14e   : > { %v1003_v31 = vmul.f32 %v1401_v28, %v1002_v27  ;;  %v1403_v37 = vpop.eup %1402 }
 0x14f   : > { %v1031_v39 = vadd.f32 1.0, %v1403_v37 }
 0x150   : > { %v1005_v33 = vadd.f32 %v1004_v32, %v1003_v31 }
 0x151   : > { %1404 = vrcp.f32 %v1031_v39 }
 0x152   : > { %v1015_v38 = vmul.f32 %v1245_v30, %v1005_v33 }
 0x154   : > { %v1023_v40 = vadd.f32 %v1022_v34, %v1015_v38 }
 0x156   : > { %1067 = vst [vmem:[%s1847_s5] sm:$0xff] %v1023_v40 }
 0x157   : > { %v974_v42 = vpop.f32.mrf.mxu0 }
 0x158   : > { %v975_v44 = vadd.f32 %v974_v42, %v367_v41 }
 0x159   : > { %v976_v45 = vpop.f32.mrf.mxu0 }
 0x15a   : > { %v1034_v46 = vadd.f32 %v1222_v43, %v975_v44  ;;  %v977_v53 = vadd.f32 %v976_v45, %v371_v52 }
 0x15b   : > { %v978_v61 = vpop.f32.mrf.mxu0 }
 0x15c   : > { %v1225_v47 = vmul.f32 -1.442695, %v1034_v46 }
 0x15d   : > { %v979_v50 = vpop.f32.mrf.mxu0 }
 0x15e   : > { %1406 = vpow2.f32 %v1225_v47  ;;  %v1405_v54 = vpop.eup %1404 }
 0x15f   : > { %v1041_v55 = vmul.f32 %v1405_v54, %v977_v53 }
 0x161   : > { %v1042_v59 = vadd.f32 %v1223_v56, %v1041_v55 }
 0x16b   : > { %v1407_v57 = vpop.eup %1406 }
 0x16c   : > { %v1038_v58 = vadd.f32 1.0, %v1407_v57 }
 0x16e   : > { %1408 = vrcp.f32 %v1038_v58 }
 0x16f   : > { %1410 = vtanh.f32 %v1042_v59 }
 0x17b   : > { %v1409_v60 = vpop.eup %1408 }
 0x17c   : > { %v1044_v62 = vsub.f32 1.0, %v1409_v60  ;;  %v1411_v63 = vpop.eup %1410  ;;  %v1046_v49 = vmul.f32 %v1409_v60, %v1589_v35 }
 0x17e   : > { %v1045_v1 = vmul.f32 %v1411_v63, %v1044_v62 }
 0x180   : > { %v1047_v3 = vadd.f32 %v1046_v49, %v1045_v1 }
 0x182   : > { %v1058_v4 = vmul.f32 %v1246_v2, %v1047_v3 }
 0x184   : > { %v1066_v5 = vadd.f32 %v1065_v51, %v1058_v4 }
 0x186   : > { %1068 = vst [vmem:[%s1847_s5 + $0x8] sm:$0xff] %v1066_v5 }
 0x187 PF: > { %s15_s18 = sadd.s32 1, %s1418_s18  }
 0x188   : > { %p12_p6 = scmp.ge.s32.totalorder %s15_s18, 10  }
 0x18a   :  { %14 = sbr.rel (!%p12_p6) target bundleno = 1 (0x1), region = 73 }

// kernel: _ae_mapper_forward.9
= control target key start
LH: loop header
LB: loop body
LE: loop exit
PB: predicated region body
PF: predicated region fallthrough
CT: control target
= control target key end

     0   :  { %v276_v1 = vmov 0   ;;  %vm64_vm0 = vcmask 130048   ;;  %v33_v16 = vlaneseq  ;;  %s433_s1 = inlined_call_operand.vmem [shape: bf16[16,384], index: 1, kind: input, shape index: {}]   ;;  %s434_s0 = inlined_call_operand.vmem [shape: f32[64,16], index: 0, kind: input, shape index: {}]   ;;  %s435_s2 = inlined_call_operand.vmem [shape: f32[1,384], index: 2, kind: input, shape index: {}]   ;;  %s436_s3 = inlined_call_operand.vmem [shape: f32[64,384], index: 3, kind: output, shape index: {}]  }
   0x1   :  { %v272_v0 = vld [vmem:[%s433_s1 + $0x4] ss:$12 sps:$4 sm:$0xff]   ;;  %109 = vmatprep.mubr.bf16.mxu0 %v276_v1  ;;  %139 = vmatprep.mubr.bf16.mxu1 %v276_v1  ;;  %v274_v2 = vld [vmem:[%s433_s1] ss:$12 sps:$4 sm:$0xff]   ;;  %v22_v7 = vld [vmem:[%s434_s0 + $0x38] sm:$0xff] }
   0x2   :  { %v15_v3 = vld [vmem:[%s434_s0] sm:$0xff]  ;;  %v16_v4 = vld [vmem:[%s434_s0 + $0x8] sm:$0xff]  ;;  %91 = vmatprep.subr.bf16.mxu0 %v272_v0  ;;  %269 = vmatprep.subr.bf16.mxu1 %v272_v0  ;;  %v21_v6 = vld [vmem:[%s434_s0 + $0x30] sm:$0xff]  ;;  %v34_v17 = vshrl.u32 %v33_v16, 7 }
   0x3   :  { %v23_v5 = vpack.c.bf16 %v16_v4, %v15_v3  ;;  %92 = vmatpush1.bf16.msra.mxu0 %v274_v2  ;;  %270 = vmatpush1.bf16.msra.mxu1 %v274_v2  ;;  %v26_v8 = vpack.c.bf16 %v22_v7, %v21_v6  ;;  %v275_v9 = vld [vmem:[%s433_s1 + $0x8] ss:$12 sps:$4 sm:$0xff]   ;;  %v18_v11 = vld [vmem:[%s434_s0 + $0x18] sm:$0xff]  ;;  %v19_v12 = vld [vmem:[%s434_s0 + $0x20] sm:$0xff] }
   0x4   :  { %259 = vmatprep.subr.bf16.mxu1 %v275_v9  ;;  %v17_v10 = vld [vmem:[%s434_s0 + $0x10] sm:$0xff]  ;;  %v20_v13 = vld [vmem:[%s434_s0 + $0x28] sm:$0xff]  ;;  %v35_v18 = vsub.s32 0, %v34_v17  ;;  %v31_v19 = vld [vmem:[%s435_s2] sm:$0x7]  ;;  %v39_v20 = vsub.s32 1, %v34_v17 }
   0x5   :  { %v24_v14 = vpack.c.bf16 %v18_v11, %v17_v10  ;;  %v25_v15 = vpack.c.bf16 %v20_v13, %v19_v12  ;;  %v43_v27 = vsub.s32 2, %v34_v17 }
   0x6   :  { %246 = vmatmul.mubr.msk.bf16.vlgmr.msra.gmra.mxu0 %vm64_vm0, %v23_v5  ;;  %249 = vmatmul.mubr.msk.bf16.vlgmr.msra.gmra.mxu1 %vm64_vm0, %v26_v8  ;;  %v341_v21 = vrot.slane %v31_v19, %v35_v18  ;;  %v343_v22 = vrot.slane %v31_v19, %v39_v20 }
   0x7   :  { %260 = vmatpush3.bf16.msra.mxu1 %v275_v9  ;;  %119 = vmatprep.mubr.bf16.mxu0 %v276_v1  ;;  %v44_v36 = vrot.slane %v31_v19, %v43_v27 }
   0x8   :  { %261 = vmatprep.mubr.msk.bf16.mxu1 %vm64_vm0, %v23_v5 }
   0xe   :  { %247 = vmatmul.mubr.msk.bf16.gmra.mxu0 %vm64_vm0, %v24_v14  ;;  %262 = vmatmul.mubr.msk.bf16.vlgmr.msra.gmra.mxu1 %vm64_vm0, %v24_v14 }
   0xf   :  { %129 = vmatprep.mubr.bf16.mxu0 %v276_v1  ;;  %265 = vmatprep.mubr.msk.bf16.mxu1 %vm64_vm0, %v25_v15 }
  0x16   :  { %248 = vmatmul.mubr.msk.bf16.gmra.mxu0 %vm64_vm0, %v25_v15  ;;  %266 = vmatmul.mubr.msk.bf16.gmra.mxu1 %vm64_vm0, %v26_v8 }
  0xc6   :  { %v111_v23 = vpop.f32.mrf.mxu0  ;;  %v141_v24 = vpop.f32.mrf.mxu1 }
  0xc7   :  { %v112_v25 = vadd.f32 %v111_v23, %v341_v21  ;;  %v142_v26 = vadd.f32 %v141_v24, %v341_v21 }
  0xc8   :  { %v113_v28 = vpop.f32.mrf.mxu0  ;;  %v143_v29 = vpop.f32.mrf.mxu1 }
  0xc9   :  { %215 = vst [vmem:[%s436_s3] sm:$0xff] %v112_v25  ;;  %233 = vst [vmem:[%s436_s3 + $0x90] sm:$0xff] %v142_v26  ;;  %v114_v30 = vadd.f32 %v113_v28, %v343_v22  ;;  %v144_v31 = vadd.f32 %v143_v29, %v343_v22 }
  0xca   :  { %v115_v32 = vpop.f32.mrf.mxu0  ;;  %v145_v33 = vpop.f32.mrf.mxu1 }
  0xcb   :  { %216 = vst [vmem:[%s436_s3 + $0x8] sm:$0xff] %v114_v30  ;;  %234 = vst [vmem:[%s436_s3 + $0x98] sm:$0xff] %v144_v31  ;;  %v116_v34 = vadd.f32 %v115_v32, %v341_v21  ;;  %v146_v35 = vadd.f32 %v145_v33, %v341_v21 }
  0xcc   :  { %v117_v37 = vpop.f32.mrf.mxu0  ;;  %v147_v38 = vpop.f32.mrf.mxu1 }
  0xcd   :  { %218 = vst [vmem:[%s436_s3 + $0x18] sm:$0xff] %v116_v34  ;;  %236 = vst [vmem:[%s436_s3 + $0xa8] sm:$0xff] %v146_v35  ;;  %v118_v39 = vadd.f32 %v117_v37, %v343_v22  ;;  %v148_v40 = vadd.f32 %v147_v38, %v343_v22 }
  0xce   :  { %v121_v41 = vpop.f32.mrf.mxu0  ;;  %v263_v42 = vpop.f32.mrf.mxu1 }
  0xcf   :  { %219 = vst [vmem:[%s436_s3 + $0x20] sm:$0xff] %v118_v39  ;;  %237 = vst [vmem:[%s436_s3 + $0xb0] sm:$0xff] %v148_v40  ;;  %v122_v43 = vadd.f32 %v121_v41, %v341_v21  ;;  %v193_v44 = vadd.f32 %v263_v42, %v44_v36 }
  0xd0   :  { %v123_v45 = vpop.f32.mrf.mxu0  ;;  %v184_v46 = vpop.f32.mrf.mxu1 }
  0xd1   :  { %221 = vst [vmem:[%s436_s3 + $0x30] sm:$0xff] %v122_v43  ;;  %223 = vst [vmem:[%s436_s3 + $0x40] sm:$0xff] %v193_v44  ;;  %v124_v47 = vadd.f32 %v123_v45, %v343_v22  ;;  %v185_v48 = vadd.f32 %v184_v46, %v44_v36 }
  0xd2   :  { %v125_v49 = vpop.f32.mrf.mxu0  ;;  %v264_v50 = vpop.f32.mrf.mxu1 }
  0xd3   :  { %222 = vst [vmem:[%s436_s3 + $0x38] sm:$0xff] %v124_v47  ;;  %217 = vst [vmem:[%s436_s3 + $0x10] sm:$0xff] %v185_v48  ;;  %v126_v51 = vadd.f32 %v125_v49, %v341_v21  ;;  %v196_v52 = vadd.f32 %v264_v50, %v44_v36 }
  0xd4   :  { %v127_v53 = vpop.f32.mrf.mxu0  ;;  %v187_v54 = vpop.f32.mrf.mxu1 }
  0xd5   :  { %224 = vst [vmem:[%s436_s3 + $0x48] sm:$0xff] %v126_v51  ;;  %226 = vst [vmem:[%s436_s3 + $0x58] sm:$0xff] %v196_v52  ;;  %v128_v55 = vadd.f32 %v127_v53, %v343_v22  ;;  %v188_v56 = vadd.f32 %v187_v54, %v44_v36 }
  0xd6   :  { %v131_v57 = vpop.f32.mrf.mxu0  ;;  %v267_v58 = vpop.f32.mrf.mxu1 }
  0xd7   :  { %225 = vst [vmem:[%s436_s3 + $0x50] sm:$0xff] %v128_v55  ;;  %220 = vst [vmem:[%s436_s3 + $0x28] sm:$0xff] %v188_v56  ;;  %v132_v59 = vadd.f32 %v131_v57, %v341_v21  ;;  %v209_v60 = vadd.f32 %v267_v58, %v44_v36 }
  0xd8   :  { %v133_v61 = vpop.f32.mrf.mxu0  ;;  %v200_v62 = vpop.f32.mrf.mxu1 }
  0xd9   :  { %227 = vst [vmem:[%s436_s3 + $0x60] sm:$0xff] %v132_v59  ;;  %235 = vst [vmem:[%s436_s3 + $0xa0] sm:$0xff] %v209_v60  ;;  %v134_v63 = vadd.f32 %v133_v61, %v343_v22  ;;  %v201_v0 = vadd.f32 %v200_v62, %v44_v36 }
  0xda   :  { %v135_v1 = vpop.f32.mrf.mxu0  ;;  %v268_v2 = vpop.f32.mrf.mxu1 }
  0xdb   :  { %228 = vst [vmem:[%s436_s3 + $0x68] sm:$0xff] %v134_v63  ;;  %229 = vst [vmem:[%s436_s3 + $0x70] sm:$0xff] %v201_v0  ;;  %v136_v3 = vadd.f32 %v135_v1, %v341_v21  ;;  %v212_v4 = vadd.f32 %v268_v2, %v44_v36 }
  0xdc   :  { %v137_v5 = vpop.f32.mrf.mxu0  ;;  %v203_v6 = vpop.f32.mrf.mxu1 }
  0xdd   :  { %230 = vst [vmem:[%s436_s3 + $0x78] sm:$0xff] %v136_v3  ;;  %238 = vst [vmem:[%s436_s3 + $0xb8] sm:$0xff] %v212_v4  ;;  %v138_v7 = vadd.f32 %v137_v5, %v343_v22  ;;  %v204_v8 = vadd.f32 %v203_v6, %v44_v36 }
  0xdf   :  { %231 = vst [vmem:[%s436_s3 + $0x80] sm:$0xff] %v138_v7  ;;  %232 = vst [vmem:[%s436_s3 + $0x88] sm:$0xff] %v204_v8 }

// kernel: _ae_mapper_forward.10
= control target key start
LH: loop header
LB: loop body
LE: loop exit
PB: predicated region body
PF: predicated region fallthrough
CT: control target
= control target key end

     0   :  { %s697_s15 = smov 0   ;;  %s800_s0 = inlined_call_operand.vmem [shape: f32[8,8,384], index: 0, kind: input, shape index: {}]   ;;  %s801_s1 = inlined_call_operand.vmem [shape: bf16[128,384], index: 1, kind: input, shape index: {}]   ;;  %s802_s2 = inlined_call_operand.vmem [shape: f32[1,384], index: 2, kind: input, shape index: {}]   ;;  %s803_s3 = inlined_call_operand.vmem [shape: f32[8,128], index: 3, kind: input, shape index: {}]   ;;  %s804_s4 = inlined_call_operand.vmem [shape: f32[8,8,128], index: 4, kind: output, shape index: {}]  }
   0x1 LB: > { %s542_s16 = sadd.s32 4294967295, %s667_s15   ;;  %p546_p0 = scmp.ge.s32.totalorder %s667_s15, 1  ;;  %s667_s15 = sphi %s697_s15, %s14_s15  }
   0x2   : > { %p162_p1 = scmp.lt.s32.totalorder %s667_s15, 9 }
   0x4   : > { %p163_p2 = pnand %p546_p0, %p162_p1 }
   0x5   : > { %p187_p3 = scmp.lt.s32.totalorder (!%p163_p2), %s542_s16, 7  ;;  %p549_p4 = scmp.ne.s32.totalorder (!%p163_p2), %s542_s16, 0 }
   0x6   : > { %166 = sbr.rel (%p163_p2) target bundleno = 305 (0x131), region = 36 }
   0xb   : > { %s188_s17 = scalar_select %p187_p3, %s542_s16, 7 }
   0xc   : > { %200 = sbr.rel (%p549_p4) target bundleno = 19 (0x13), region = 40 }
   0xd   : > { %s607_s18 = smul.u32 24, %s188_s17  ;;  %s548_s19 = sshll.u32 %s188_s17, 3 }
   0xe   : > { %s708_s22 = scalar_lea.vmem %s804_s4, %s548_s19 }
   0xf   : > { %s713_s25 = scalar_lea.vmem %s800_s0, %s607_s18 }
  0x11   : > { %v201_v0 = vld [vmem:[%s803_s3] sm:$0xff] }
  0x12   : > { %202 = vst [vmem:[#allocation2] sm:$0xff] %v201_v0 }
  0x13 PF: > { %v619_v1 = vld [vmem:[%s801_s1 + $0xac] ss:$12 sps:$4 sm:$0xff]   ;;  %v621_v2 = vld [vmem:[%s801_s1 + $0xa8] ss:$12 sps:$4 sm:$0xff]   ;;  %v669_v3 = vmov 0.0   ;;  %v670_v4 = vmov 0   ;;  %v239_v29 = vlaneseq }
  0x14   : > { %587 = vmatprep.subr.bf16.mxu1 %v669_v3  ;;  %414 = vmatprep.mubr.bf16.mxu0 %v670_v4  ;;  %v622_v5 = vld [vmem:[%s801_s1 + $0x94] ss:$12 sps:$4 sm:$0xff]   ;;  %vm671_vm0 = vmmov 0   ;;  %v624_v6 = vld [vmem:[%s801_s1 + $0x90] ss:$12 sps:$4 sm:$0xff]   ;;  %v464_v44 = vld [vmem:[%s713_s25 + $0x8] sm:$0xff] }
  0x15   : > { %382 = vmatprep.subr.bf16.mxu0 %v619_v1  ;;  %603 = vmatprep.mubr.msk.bf16.mxu1 %vm671_vm0, %v669_v3  ;;  %v625_v7 = vld [vmem:[%s801_s1 + $0x7c] ss:$12 sps:$4 sm:$0xff]   ;;  %v627_v8 = vld [vmem:[%s801_s1 + $0x78] ss:$12 sps:$4 sm:$0xff]   ;;  %v630_v10 = vld [vmem:[%s801_s1 + $0x60] ss:$12 sps:$4 sm:$0xff]  }
  0x16   : > { %383 = vmatpush1.bf16.msra.mxu0 %v621_v2  ;;  %v628_v9 = vld [vmem:[%s801_s1 + $0x64] ss:$12 sps:$4 sm:$0xff]   ;;  %v631_v12 = vld [vmem:[%s801_s1 + $0x4c] ss:$12 sps:$4 sm:$0xff]   ;;  %v633_v14 = vld [vmem:[%s801_s1 + $0x48] ss:$12 sps:$4 sm:$0xff]  }
  0x17   : > { %384 = vmatprep.subr.bf16.mxu0 %v622_v5  ;;  %v643_v11 = vld [vmem:[%s801_s1 + $0xb0] ss:$12 sps:$4 sm:$0xff]   ;;  %v644_v13 = vld [vmem:[%s801_s1 + $0x98] ss:$12 sps:$4 sm:$0xff]   ;;  %v634_v15 = vld [vmem:[%s801_s1 + $0x34] ss:$12 sps:$4 sm:$0xff]  }
  0x18   : > { %588 = vmatpush3.bf16.msra.mxu1 %v643_v11  ;;  %v645_v16 = vld [vmem:[%s801_s1 + $0x80] ss:$12 sps:$4 sm:$0xff]   ;;  %v636_v17 = vld [vmem:[%s801_s1 + $0x30] ss:$12 sps:$4 sm:$0xff]   ;;  %v646_v19 = vld [vmem:[%s801_s1 + $0x68] ss:$12 sps:$4 sm:$0xff]  }
  0x19   : > { %589 = vmatprep.subr.bf16.mxu1 %v669_v3  ;;  %v637_v18 = vld [vmem:[%s801_s1 + $0x1c] ss:$12 sps:$4 sm:$0xff]   ;;  %v639_v20 = vld [vmem:[%s801_s1 + $0x18] ss:$12 sps:$4 sm:$0xff]   ;;  %v642_v23 = vld [vmem:[%s801_s1] ss:$12 sps:$4 sm:$0xff]  }
  0x1a   : > { %385 = vmatpush1.bf16.msra.mxu0 %v624_v6  ;;  %v640_v21 = vld [vmem:[%s801_s1 + $0x4] ss:$12 sps:$4 sm:$0xff]   ;;  %v649_v27 = vld [vmem:[%s801_s1 + $0x20] ss:$12 sps:$4 sm:$0xff]   ;;  %v650_v28 = vld [vmem:[%s801_s1 + $0x8] ss:$12 sps:$4 sm:$0xff]  }
  0x1b   : > { %386 = vmatprep.subr.bf16.mxu0 %v625_v7  ;;  %v647_v22 = vld [vmem:[%s801_s1 + $0x50] ss:$12 sps:$4 sm:$0xff]   ;;  %v203_v24 = vld [vmem:[#allocation2] sm:$0xff]  ;;  %v240_v30 = vshrl.u32 %v239_v29, 7 }
  0x1c   : > { %590 = vmatpush3.bf16.msra.mxu1 %v644_v13  ;;  %v648_v25 = vld [vmem:[%s801_s1 + $0x38] ss:$12 sps:$4 sm:$0xff]   ;;  %v204_v26 = vpack.c.bf16 %v203_v24, %v203_v24  ;;  %v237_v32 = vld [vmem:[%s802_s2] sm:$0x7]  ;;  %v465_v60 = vld [vmem:[%s713_s25 + $0x10] sm:$0xff] }
  0x1d   : > { %591 = vmatprep.subr.bf16.mxu1 %v669_v3  ;;  %v241_v31 = vsub.s32 0, %v240_v30  ;;  %v245_v34 = vsub.s32 1, %v240_v30  ;;  %v463_v36 = vld [vmem:[%s713_s25] sm:$0xff]  ;;  %v249_v54 = vsub.s32 2, %v240_v30 }
  0x1e   : > { %387 = vmatpush1.bf16.msra.mxu0 %v627_v8 }
  0x1f   : > { %388 = vmatprep.subr.bf16.mxu0 %v628_v9  ;;  %v242_v33 = vrot.slane %v237_v32, %v241_v31  ;;  %v246_v38 = vrot.slane %v237_v32, %v245_v34  ;;  %v250_v55 = vrot.slane %v237_v32, %v249_v54 }
  0x20   : > { %592 = vmatpush3.bf16.msra.mxu1 %v645_v16 }
  0x21   : > { %593 = vmatprep.subr.bf16.mxu1 %v669_v3 }
  0x22   : > { %389 = vmatpush1.bf16.msra.mxu0 %v630_v10 }
  0x23   : > { %390 = vmatprep.subr.bf16.mxu0 %v631_v12 }
  0x24   : > { %594 = vmatpush3.bf16.msra.mxu1 %v646_v19 }
  0x25   : > { %595 = vmatprep.subr.bf16.mxu1 %v669_v3 }
  0x26   : > { %391 = vmatpush1.bf16.msra.mxu0 %v633_v14 }
  0x27   : > { %392 = vmatprep.subr.bf16.mxu0 %v634_v15 }
  0x28   : > { %596 = vmatpush3.bf16.msra.mxu1 %v647_v22 }
  0x29   : > { %597 = vmatprep.subr.bf16.mxu1 %v669_v3 }
  0x2a   : > { %393 = vmatpush1.bf16.msra.mxu0 %v636_v17 }
  0x2b   : > { %394 = vmatprep.subr.bf16.mxu0 %v637_v18 }
  0x2c   : > { %598 = vmatpush3.bf16.msra.mxu1 %v648_v25 }
  0x2d   : > { %599 = vmatprep.subr.bf16.mxu1 %v669_v3 }
  0x2e   : > { %395 = vmatpush1.bf16.msra.mxu0 %v639_v20 }
  0x2f   : > { %396 = vmatprep.subr.bf16.mxu0 %v640_v21 }
  0x30   : > { %600 = vmatpush3.bf16.msra.mxu1 %v649_v27 }
  0x31   : > { %601 = vmatprep.subr.bf16.mxu1 %v669_v3 }
  0x32   : > { %397 = vmatpush1.bf16.msra.mxu0 %v642_v23 }
  0x34   : > { %602 = vmatpush3.bf16.msra.mxu1 %v650_v28 }
  0x35   : > { %415 = vmatmul.mubr.bf16.vlgmr.msra.gmra.mxu0 %v204_v26 }
  0x37   : > { %604 = vmatmul.mubr.bf16.vlgmr.msra.gmra.mxu1 %v204_v26 }
  0xf5   : > { %v416_v35 = vpop.f32.mrf.mxu0 }
  0xf6   : > { %v417_v37 = vadd.f32 %v416_v35, %v242_v33 }
  0xf7   : > { %v418_v39 = vpop.f32.mrf.mxu0  ;;  %v457_v47 = vpop.f32.mrf.mxu1 }
  0xf8   : > { %v466_v40 = vadd.f32 %v463_v36, %v417_v37  ;;  %v419_v43 = vadd.f32 %v418_v39, %v246_v38  ;;  %v458_v58 = vadd.f32 %v457_v47, %v250_v55 }
  0xf9   : > { %v420_v41 = vpop.f32.mrf.mxu0  ;;  %v605_v48 = vpop.f32.mrf.mxu1 }
  0xfa   : > { %v574_v42 = vmul.f32 -1.442695, %v466_v40  ;;  %v473_v46 = vadd.f32 %v464_v44, %v419_v43 }
  0xfb   : > { %v421_v45 = vpop.f32.mrf.mxu0  ;;  %v460_v50 = vpop.f32.mrf.mxu1 }
  0xfc   : > { %651 = vpow2.f32 %v574_v42  ;;  %v575_v49 = vmul.f32 -1.442695, %v473_v46 }
  0xfd   : > { %v606_v51 = vpop.f32.mrf.mxu1 }
  0xfe   : > { %653 = vpow2.f32 %v575_v49 }
 0x109   : > { %v652_v52 = vpop.eup %651 }
 0x10a   : > { %v470_v53 = vadd.f32 1.0, %v652_v52 }
 0x10b   : > { %v654_v56 = vpop.eup %653 }
 0x10c   : > { %655 = vrcp.f32 %v470_v53  ;;  %v477_v57 = vadd.f32 1.0, %v654_v56 }
 0x10e   : > { %657 = vrcp.f32 %v477_v57 }
 0x119   : > { %v656_v59 = vpop.eup %655 }
 0x11a   : > { %v480_v61 = vmul.f32 %v656_v59, %v458_v58 }
 0x11b   : > { %v658_v63 = vpop.eup %657 }
 0x11c   : > { %v481_v62 = vadd.f32 %v480_v61, %v465_v60  ;;  %v483_v0 = vsub.f32 1.0, %v658_v63  ;;  %v485_v2 = vmul.f32 %v658_v63, %v203_v24 }
 0x11e   : > { %659 = vtanh.f32 %v481_v62 }
 0x12b   : > { %v660_v1 = vpop.eup %659 }
 0x12c   : > { %v484_v3 = vmul.f32 %v660_v1, %v483_v0 }
 0x12e   : > { %v486_v4 = vadd.f32 %v485_v2, %v484_v3 }
 0x130   : > { %487 = vst [vmem:[#allocation2] sm:$0xff] %v486_v4  ;;  %488 = vst [vmem:[%s708_s22] sm:$0xff] %v486_v4 }
 0x131 PF: > { %s14_s15 = sadd.s32 1, %s667_s15  }
 0x132   : > { %p11_p5 = scmp.ge.s32.totalorder %s14_s15, 10  }
 0x134   :  { %13 = sbr.rel (!%p11_p5) target bundleno = 1 (0x1), region = 70 }

// kernel: _ae_mapper_forward.11
= control target key start
LH: loop header
LB: loop body
LE: loop exit
PB: predicated region body
PF: predicated region fallthrough
CT: control target
= control target key end

     0   :  { %s339_s1 = inlined_call_operand.vmem [shape: bf16[128,128], index: 1, kind: input, shape index: {}]   ;;  %s340_s0 = inlined_call_operand.vmem [shape: f32[64,128], index: 0, kind: input, shape index: {}]   ;;  %s341_s2 = inlined_call_operand.vmem [shape: f32[1,128], index: 2, kind: input, shape index: {}]   ;;  %s342_s3 = inlined_call_operand.vmem [shape: f32[64,128], index: 3, kind: output, shape index: {}]  }
   0x1   :  { %v236_v0 = vld [vmem:[%s339_s1 + $0x38] sm:$0xff]   ;;  %v237_v1 = vld [vmem:[%s339_s1 + $0x30] sm:$0xff]   ;;  %v238_v2 = vld [vmem:[%s339_s1 + $0x28] sm:$0xff]  }
   0x2   :  { %196 = vmatprep.subr.bf16.mxu0 %v236_v0  ;;  %220 = vmatprep.subr.bf16.mxu1 %v236_v0  ;;  %v239_v3 = vld [vmem:[%s339_s1 + $0x20] sm:$0xff]   ;;  %v16_v5 = vld [vmem:[%s340_s0 + $0x8] sm:$0xff]  ;;  %v240_v10 = vld [vmem:[%s339_s1 + $0x18] sm:$0xff]  }
   0x3   :  { %197 = vmatpush3.bf16.msra.mxu0 %v236_v0  ;;  %228 = vmatpush3.bf16.msra.mxu1 %v236_v0  ;;  %v15_v4 = vld [vmem:[%s340_s0] sm:$0xff]  ;;  %v20_v8 = vld [vmem:[%s340_s0 + $0x28] sm:$0xff]  ;;  %v241_v11 = vld [vmem:[%s339_s1 + $0x10] sm:$0xff]  }
   0x4   :  { %198 = vmatprep.subr.bf16.mxu0 %v237_v1  ;;  %221 = vmatprep.subr.bf16.mxu1 %v237_v1  ;;  %v19_v6 = vld [vmem:[%s340_s0 + $0x20] sm:$0xff]  ;;  %v23_v7 = vpack.c.bf16 %v16_v5, %v15_v4  ;;  %v242_v12 = vld [vmem:[%s339_s1 + $0x8] sm:$0xff]   ;;  %v17_v14 = vld [vmem:[%s340_s0 + $0x10] sm:$0xff] }
   0x5   :  { %v25_v9 = vpack.c.bf16 %v20_v8, %v19_v6  ;;  %v243_v13 = vld [vmem:[%s339_s1] sm:$0xff]   ;;  %v18_v15 = vld [vmem:[%s340_s0 + $0x18] sm:$0xff]  ;;  %v21_v16 = vld [vmem:[%s340_s0 + $0x30] sm:$0xff] }
   0x6   :  { %212 = vmatprep.mubr.bf16.mxu0 %v23_v7  ;;  %v22_v17 = vld [vmem:[%s340_s0 + $0x38] sm:$0xff]  ;;  %v24_v18 = vpack.c.bf16 %v18_v15, %v17_v14  ;;  %v175_v20 = vld [vmem:[%s341_s2] ss:$0 sm:$0xff] }
   0x7   :  { %199 = vmatpush3.bf16.msra.mxu0 %v237_v1  ;;  %229 = vmatpush3.bf16.msra.mxu1 %v237_v1  ;;  %v26_v19 = vpack.c.bf16 %v22_v17, %v21_v16 }
   0x8   :  { %200 = vmatprep.subr.bf16.mxu0 %v238_v2  ;;  %222 = vmatprep.subr.bf16.mxu1 %v238_v2 }
   0x9   :  { %216 = vmatprep.mubr.bf16.mxu1 %v25_v9 }
   0xb   :  { %201 = vmatpush3.bf16.msra.mxu0 %v238_v2  ;;  %230 = vmatpush3.bf16.msra.mxu1 %v238_v2 }
   0xc   :  { %202 = vmatprep.subr.bf16.mxu0 %v239_v3  ;;  %223 = vmatprep.subr.bf16.mxu1 %v239_v3 }
   0xf   :  { %203 = vmatpush3.bf16.msra.mxu0 %v239_v3  ;;  %231 = vmatpush3.bf16.msra.mxu1 %v239_v3 }
  0x10   :  { %204 = vmatprep.subr.bf16.mxu0 %v240_v10  ;;  %224 = vmatprep.subr.bf16.mxu1 %v240_v10 }
  0x13   :  { %205 = vmatpush3.bf16.msra.mxu0 %v240_v10  ;;  %232 = vmatpush3.bf16.msra.mxu1 %v240_v10 }
  0x14   :  { %206 = vmatprep.subr.bf16.mxu0 %v241_v11  ;;  %225 = vmatprep.subr.bf16.mxu1 %v241_v11 }
  0x17   :  { %207 = vmatpush3.bf16.msra.mxu0 %v241_v11  ;;  %233 = vmatpush3.bf16.msra.mxu1 %v241_v11 }
  0x18   :  { %208 = vmatprep.subr.bf16.mxu0 %v242_v12  ;;  %226 = vmatprep.subr.bf16.mxu1 %v242_v12 }
  0x1b   :  { %209 = vmatpush3.bf16.msra.mxu0 %v242_v12  ;;  %234 = vmatpush3.bf16.msra.mxu1 %v242_v12 }
  0x1c   :  { %210 = vmatprep.subr.bf16.mxu0 %v243_v13  ;;  %227 = vmatprep.subr.bf16.mxu1 %v243_v13 }
  0x1f   :  { %211 = vmatpush3.bf16.msra.mxu0 %v243_v13  ;;  %235 = vmatpush3.bf16.msra.mxu1 %v243_v13 }
  0x22   :  { %213 = vmatmul.mubr.bf16.vlgmr.msra.gmra.mxu0 %v24_v18  ;;  %217 = vmatmul.mubr.bf16.vlgmr.msra.gmra.mxu1 %v26_v19 }
  0xe2   :  { %v214_v21 = vpop.f32.mrf.mxu0  ;;  %v218_v22 = vpop.f32.mrf.mxu1 }
  0xe3   :  { %v141_v23 = vadd.f32 %v214_v21, %v175_v20  ;;  %v157_v24 = vadd.f32 %v218_v22, %v175_v20 }
  0xe4   :  { %v132_v25 = vpop.f32.mrf.mxu0  ;;  %v148_v26 = vpop.f32.mrf.mxu1 }
  0xe5   :  { %165 = vst [vmem:[%s342_s3 + $0x10] sm:$0xff] %v141_v23  ;;  %169 = vst [vmem:[%s342_s3 + $0x30] sm:$0xff] %v157_v24  ;;  %v133_v27 = vadd.f32 %v175_v20, %v132_v25  ;;  %v149_v28 = vadd.f32 %v175_v20, %v148_v26 }
  0xe6   :  { %v215_v29 = vpop.f32.mrf.mxu0  ;;  %v219_v30 = vpop.f32.mrf.mxu1 }
  0xe7   :  { %163 = vst [vmem:[%s342_s3] sm:$0xff] %v133_v27  ;;  %167 = vst [vmem:[%s342_s3 + $0x20] sm:$0xff] %v149_v28  ;;  %v144_v31 = vadd.f32 %v215_v29, %v175_v20  ;;  %v160_v32 = vadd.f32 %v219_v30, %v175_v20 }
  0xe8   :  { %v135_v33 = vpop.f32.mrf.mxu0  ;;  %v151_v34 = vpop.f32.mrf.mxu1 }
  0xe9   :  { %166 = vst [vmem:[%s342_s3 + $0x18] sm:$0xff] %v144_v31  ;;  %170 = vst [vmem:[%s342_s3 + $0x38] sm:$0xff] %v160_v32  ;;  %v136_v35 = vadd.f32 %v175_v20, %v135_v33  ;;  %v152_v36 = vadd.f32 %v175_v20, %v151_v34 }
  0xeb   :  { %164 = vst [vmem:[%s342_s3 + $0x8] sm:$0xff] %v136_v35  ;;  %168 = vst [vmem:[%s342_s3 + $0x28] sm:$0xff] %v152_v36 }

</bundles_post_ra>
